<compile_context>
chip_gen: v6e
topology: v6e:2x2x1
jax: 0.10.0
libtpu: 0.0.40
codegen_flags: <defaults>
</compile_context>

<pallas_src>
import functools

import jax
import jax.numpy as jnp
from jax import lax
from jax.experimental import pallas as pl
from jax.experimental.pallas import tpu as pltpu


# ------------------------------ in-kernel helpers ------------------------------

def _layernorm(x, g, b, eps=1e-5):
    # torch nn.LayerNorm: biased variance, eps inside the sqrt.
    mean = jnp.mean(x, axis=-1, keepdims=True)
    var = jnp.mean((x - mean) ** 2, axis=-1, keepdims=True)
    return (x - mean) * lax.rsqrt(var + eps) * g + b


# ----------------------------------- kernel ------------------------------------

def transformer_block_kernel(x_ref, g1_ref, be1_ref, wqkv_ref, wout_ref,
                             bout_ref, mask_ref, g2_ref, be2_ref, w1_ref,
                             b1_ref, w2_ref, b2_ref, o_ref):
    """Full TransformerBlock forward for one batch element (one grid step)."""
    x = x_ref[0].astype(jnp.float32)                       # (L, H) f32
    L, H = x.shape

    # -------- attention branch: x += to_out(LinearAttention(LN1(x))) --------
    nx = _layernorm(x, g1_ref[...], be1_ref[...])
    qkv = jnp.dot(nx.astype(jnp.bfloat16), wqkv_ref[...],
                  preferred_element_type=jnp.float32)      # (L, 3H)
    # Column order is (qkv, head, dim_head), matching the torch rearrange.
    # With H % 128 == 0 these slices are lane-aligned (no relayout).
    q = qkv[:, :H]
    k = qkv[:, H:2 * H]
    v = qkv[:, 2 * H:]

    # k.softmax(dim=-1): softmax over the sequence axis, per channel (f32).
    k = k - jnp.max(k, axis=0, keepdims=True)
    ek = jnp.exp(k)
    k_sm = ek * pl.reciprocal(jnp.sum(ek, axis=0, keepdims=True), approx=True)

    # q.softmax(dim=-2): softmax over dim_head within each head, WITHOUT the
    # (L, heads, dh) reshape: subtract the per-row max (softmax is shift
    # invariant inside each group), then compute the per-head exp-sum with a
    # matmul against the block-diagonal 0/1 head mask. Layout stays (L, H).
    q = q - jnp.max(q, axis=-1, keepdims=True)
    eq = jnp.exp(q)
    denom = jnp.dot(eq.astype(jnp.bfloat16), mask_ref[...],
                    preferred_element_type=jnp.float32)    # (L, H) group sums
    q_sm = eq * pl.reciprocal(denom, approx=True)

    # Per-head context for all heads at once: one fat (H,L)@(L,H) MXU matmul,
    # then zero cross-head blocks with the precomputed mask (no iota per step).
    #   ctx[h*dh+d, h*dh+e] = sum_l k_sm[l, h*dh+d] * v[l, h*dh+e]
    # TODO(synk): for H > 256 switch to a batched per-head dot_general; the
    # block-diag trick wastes heads-times MXU FLOPs past the native width.
    ctx = lax.dot_general(k_sm.astype(jnp.bfloat16), v.astype(jnp.bfloat16),
                          (((0,), (0,)), ((), ())),
                          preferred_element_type=jnp.float32)       # (H, H)
    ctx = ctx * mask_ref[...]

    # out[l, h*dh+e] = sum_d q_sm[l, h*dh+d] * ctx[h*dh+d, h*dh+e]
    out = jnp.dot(q_sm.astype(jnp.bfloat16), ctx.astype(jnp.bfloat16),
                  preferred_element_type=jnp.float32)               # (L, H)

    y = jnp.dot(out.astype(jnp.bfloat16), wout_ref[...],
                preferred_element_type=jnp.float32) + bout_ref[...]
    x = x + y                                      # residual 1 (dropout1 = id)

    # -------- feed-forward branch, fused (no HBM round trip): x += FFN(LN2(x))
    nx2 = _layernorm(x, g2_ref[...], be2_ref[...])
    h = jnp.dot(nx2.astype(jnp.bfloat16), w1_ref[...],
                preferred_element_type=jnp.float32) + b1_ref[...]
    h = h * jax.nn.sigmoid(h)                      # SiLU in f32
    y2 = jnp.dot(h.astype(jnp.bfloat16), w2_ref[...],
                 preferred_element_type=jnp.float32) + b2_ref[...]

    o_ref[0] = (x + y2).astype(o_ref.dtype)        # residual 2 (dropout2 = id)


# ---------------------------------- wrapper -------------------------------------

def transformer_block_forward(x, params, heads):
    """TransformerBlock.forward fused into one pallas_call, grid over batch."""
    B, L, H = x.shape
    assert H % heads == 0
    dh = H // heads
    H2 = params["ff_w1"].shape[1]

    # Block-diagonal 0/1 head mask, reused for the q-softmax group sum and the
    # cross-head masking of the context matrix (computed once outside).
    hid = jnp.arange(H, dtype=jnp.int32) // dh
    mask = (hid[:, None] == hid[None, :]).astype(jnp.bfloat16)

    def full(shape):
        return pl.BlockSpec(shape, lambda b, _n=len(shape): (0,) * _n)

    # TODO(synk): for very long L, add an 'arbitrary' grid axis over sequence
    # tiles (two-pass k-softmax + f32 VMEM ctx accumulation, bf16 qkv tile);
    # for very small L, pack several batch elements per grid step instead.
    return pl.pallas_call(
        transformer_block_kernel,
        out_shape=jax.ShapeDtypeStruct((B, L, H), x.dtype),
        grid=(B,),
        in_specs=[
            pl.BlockSpec((1, L, H), lambda b: (b, 0, 0)),   # x
            full((1, H)), full((1, H)),                     # norm1 gamma/beta
            full((H, 3 * H)),                               # wqkv
            full((H, H)), full((1, H)),                     # wout, bout
            full((H, H)),                                   # head mask
            full((1, H)), full((1, H)),                     # norm2 gamma/beta
            full((H, H2)), full((1, H2)),                   # ff_w1, ff_b1
            full((H2, H)), full((1, H)),                    # ff_w2, ff_b2
        ],
        out_specs=pl.BlockSpec((1, L, H), lambda b: (b, 0, 0)),
        compiler_params=pltpu.CompilerParams(
            dimension_semantics=("parallel",)),
    )(x,
      params["g1"].reshape(1, H), params["be1"].reshape(1, H),
      params["wqkv"], params["wout"], params["bout"].reshape(1, H),
      mask,
      params["g2"].reshape(1, H), params["be2"].reshape(1, H),
      params["ff_w1"], params["ff_b1"].reshape(1, H2),
      params["ff_w2"], params["ff_b2"].reshape(1, H))


# --------------------------------- parameters -----------------------------------

def init_params(key, dim):
    """Weights stored pre-transposed ((Cin, Cout)); matmul weights in bf16."""
    ks = jax.random.split(key, 6)
    H = dim

    def w(k, shape, fan_in):
        return jax.random.normal(k, shape, jnp.float32) / jnp.sqrt(fan_in)

    return dict(
        # norm1 / attention (to_qkv has no bias, to_out has bias)
        g1=jnp.ones((H,), jnp.float32), be1=jnp.zeros((H,), jnp.float32),
        wqkv=w(ks[0], (H, 3 * H), H).astype(jnp.bfloat16),
        wout=w(ks[1], (H, H), H).astype(jnp.bfloat16),
        bout=0.1 * w(ks[2], (H,), 1.0),
        # norm2 / feed_forward
        g2=jnp.ones((H,), jnp.float32), be2=jnp.zeros((H,), jnp.float32),
        ff_w1=w(ks[3], (H, 2 * H), H).astype(jnp.bfloat16),
        ff_b1=0.1 * w(ks[4], (2 * H,), 1.0),
        ff_w2=w(ks[5], (2 * H, H), 2 * H).astype(jnp.bfloat16),
        ff_b2=jnp.zeros((H,), jnp.float32),
    )


# ------------------------------ pure-JAX reference -------------------------------

def reference_forward(x, params, heads):
    """f32 reference mirroring the PyTorch TransformerBlock forward."""
    B, L, H = x.shape
    dh = H // heads
    f32 = lambda a: a.astype(jnp.float32)
    xf = f32(x)

    def ln(v, g, b):
        m = jnp.mean(v, -1, keepdims=True)
        var = jnp.mean((v - m) ** 2, -1, keepdims=True)
        return (v - m) / jnp.sqrt(var + 1e-5) * g + b

    # attention branch
    nx = ln(xf, params["g1"], params["be1"])
    qkv = nx @ f32(params["wqkv"])                        # (B, L, 3H)
    qkv = qkv.reshape(B, L, 3, heads, dh)
    q, k, v = qkv[:, :, 0], qkv[:, :, 1], qkv[:, :, 2]    # (B, L, heads, dh)
    k = jax.nn.softmax(k, axis=1)                         # over L
    q = jax.nn.softmax(q, axis=-1)                        # over dim_head
    context = jnp.einsum("blhd,blhe->bhde", k, v)
    out = jnp.einsum("blhd,bhde->blhe", q, context).reshape(B, L, H)
    xf = xf + out @ f32(params["wout"]) + params["bout"]
    # feed-forward branch
    nx = ln(xf, params["g2"], params["be2"])
    h = nx @ f32(params["ff_w1"]) + params["ff_b1"]
    h = h * jax.nn.sigmoid(h)
    return xf + h @ f32(params["ff_w2"]) + params["ff_b2"]


# ------------------------------------- main --------------------------------------

if __name__ == "__main__":
    # H = 128 keeps the kernel lane-dense; heads=4 -> dim_head=32 (dim // heads,
    # as in TransformerBlock.__init__). B=4 gives >=2 parallel steps per core.
    B, L, dim, n_heads = 4, 64, 128, 4
    key = jax.random.PRNGKey(0)
    kx, kp = jax.random.split(key)

    x = jax.random.normal(kx, (B, L, dim), jnp.float32)
    params = init_params(kp, dim)

    fwd = jax.jit(functools.partial(transformer_block_forward, heads=n_heads))
    out = jax.block_until_ready(fwd(x, params))
    assert out.shape == (B, L, dim) and out.dtype == x.dtype

    ref = reference_forward(x, params, n_heads)
    err = float(jnp.max(jnp.abs(out - ref)))
    assert err < 5e-2, f"max abs error vs reference: {err}"
    print("KERNEL_OK")
</pallas_src>

<mosaic_0001>
module attributes {stable_mosaic.version = 11 : i64} {
  func.func @transformer_block_kernel(%arg0: i32, %arg1: memref<1x64x128xf32, #tpu.memory_space<vmem>>, %arg2: memref<1x128xf32, #tpu.memory_space<vmem>>, %arg3: memref<1x128xf32, #tpu.memory_space<vmem>>, %arg4: memref<128x384xbf16, #tpu.memory_space<vmem>>, %arg5: memref<128x128xbf16, #tpu.memory_space<vmem>>, %arg6: memref<1x128xf32, #tpu.memory_space<vmem>>, %arg7: memref<128x128xbf16, #tpu.memory_space<vmem>>, %arg8: memref<1x128xf32, #tpu.memory_space<vmem>>, %arg9: memref<1x128xf32, #tpu.memory_space<vmem>>, %arg10: memref<128x256xbf16, #tpu.memory_space<vmem>>, %arg11: memref<1x256xf32, #tpu.memory_space<vmem>>, %arg12: memref<256x128xbf16, #tpu.memory_space<vmem>>, %arg13: memref<1x128xf32, #tpu.memory_space<vmem>>, %arg14: memref<1x64x128xf32, #tpu.memory_space<vmem>>) attributes {dimension_semantics = [#tpu.dimension_semantics<parallel>], iteration_bounds = array<i64: 4>, scalar_prefetch = 0 : i64, scratch_operands = 0 : i64, tpu.core_type = #tpu.core_type<tc>, window_params = [{transform_indices = @transform_0, window_bounds = array<i64: 1, 64, 128>}, {pipeline_mode = #tpu.pipeline_mode<synchronous>, transform_indices = @transform_1, window_bounds = array<i64: 1, 128>}, {pipeline_mode = #tpu.pipeline_mode<synchronous>, transform_indices = @transform_2, window_bounds = array<i64: 1, 128>}, {pipeline_mode = #tpu.pipeline_mode<synchronous>, transform_indices = @transform_3, window_bounds = array<i64: 128, 384>}, {pipeline_mode = #tpu.pipeline_mode<synchronous>, transform_indices = @transform_4, window_bounds = array<i64: 128, 128>}, {pipeline_mode = #tpu.pipeline_mode<synchronous>, transform_indices = @transform_5, window_bounds = array<i64: 1, 128>}, {pipeline_mode = #tpu.pipeline_mode<synchronous>, transform_indices = @transform_6, window_bounds = array<i64: 128, 128>}, {pipeline_mode = #tpu.pipeline_mode<synchronous>, transform_indices = @transform_7, window_bounds = array<i64: 1, 128>}, {pipeline_mode = #tpu.pipeline_mode<synchronous>, transform_indices = @transform_8, window_bounds = array<i64: 1, 128>}, {pipeline_mode = #tpu.pipeline_mode<synchronous>, transform_indices = @transform_9, window_bounds = array<i64: 128, 256>}, {pipeline_mode = #tpu.pipeline_mode<synchronous>, transform_indices = @transform_10, window_bounds = array<i64: 1, 256>}, {pipeline_mode = #tpu.pipeline_mode<synchronous>, transform_indices = @transform_11, window_bounds = array<i64: 256, 128>}, {pipeline_mode = #tpu.pipeline_mode<synchronous>, transform_indices = @transform_12, window_bounds = array<i64: 1, 128>}, {transform_indices = @transform_13, window_bounds = array<i64: 1, 64, 128>}]} {
    %c0 = arith.constant 0 : index
    %c0_0 = arith.constant 0 : index
    %c0_1 = arith.constant 0 : index
    %0 = vector.load %arg1[%c0, %c0_0, %c0_1] : memref<1x64x128xf32, #tpu.memory_space<vmem>>, vector<1x64x128xf32>
    %1 = vector.shape_cast %0 : vector<1x64x128xf32> to vector<64x128xf32>
    %c0_2 = arith.constant 0 : index
    %c0_3 = arith.constant 0 : index
    %2 = vector.load %arg2[%c0_2, %c0_3] : memref<1x128xf32, #tpu.memory_space<vmem>>, vector<1x128xf32>
    %c0_4 = arith.constant 0 : index
    %c0_5 = arith.constant 0 : index
    %3 = vector.load %arg3[%c0_4, %c0_5] : memref<1x128xf32, #tpu.memory_space<vmem>>, vector<1x128xf32>
    %cst = arith.constant dense<0.000000e+00> : vector<64xf32>
    %4 = vector.multi_reduction <add>, %1, %cst [1] : vector<64x128xf32> to vector<64xf32>
    %5 = vector.shape_cast %4 : vector<64xf32> to vector<64x1xf32>
    %cst_6 = arith.constant 1.280000e+02 : f32
    %6 = vector.broadcast %cst_6 : f32 to vector<64x1xf32>
    %7 = arith.divf %5, %6 : vector<64x1xf32>
    %8 = vector.broadcast %7 : vector<64x1xf32> to vector<64x128xf32>
    %9 = arith.subf %1, %8 : vector<64x128xf32>
    %10 = arith.mulf %9, %9 : vector<64x128xf32>
    %cst_7 = arith.constant dense<0.000000e+00> : vector<64xf32>
    %11 = vector.multi_reduction <add>, %10, %cst_7 [1] : vector<64x128xf32> to vector<64xf32>
    %12 = vector.shape_cast %11 : vector<64xf32> to vector<64x1xf32>
    %cst_8 = arith.constant 1.280000e+02 : f32
    %13 = vector.broadcast %cst_8 : f32 to vector<64x1xf32>
    %14 = arith.divf %12, %13 : vector<64x1xf32>
    %15 = vector.broadcast %7 : vector<64x1xf32> to vector<64x128xf32>
    %16 = arith.subf %1, %15 : vector<64x128xf32>
    %cst_9 = arith.constant 9.99999974E-6 : f32
    %17 = vector.broadcast %cst_9 : f32 to vector<64x1xf32>
    %18 = arith.addf %14, %17 : vector<64x1xf32>
    %19 = math.rsqrt %18 : vector<64x1xf32>
    %20 = vector.broadcast %19 : vector<64x1xf32> to vector<64x128xf32>
    %21 = arith.mulf %16, %20 : vector<64x128xf32>
    %22 = vector.broadcast %2 : vector<1x128xf32> to vector<64x128xf32>
    %23 = arith.mulf %21, %22 : vector<64x128xf32>
    %24 = vector.broadcast %3 : vector<1x128xf32> to vector<64x128xf32>
    %25 = arith.addf %23, %24 : vector<64x128xf32>
    %26 = arith.truncf %25 : vector<64x128xf32> to vector<64x128xbf16>
    %c0_10 = arith.constant 0 : index
    %c0_11 = arith.constant 0 : index
    %27 = vector.load %arg4[%c0_10, %c0_11] : memref<128x384xbf16, #tpu.memory_space<vmem>>, vector<128x384xbf16>
    %cst_12 = arith.constant dense<0.000000e+00> : vector<64x384xf32>
    %28 = tpu.matmul %26, %27, %cst_12 {dimension_numbers = #tpu.dot_dimension_numbers<[1], [0], [0], [1], [0, 0, 1, 1], [], []>} : vector<64x128xbf16>, vector<128x384xbf16>, vector<64x384xf32> -> vector<64x384xf32>
    %29 = vector.extract_strided_slice %28 {offsets = [0, 0], sizes = [64, 128], strides = [1, 1]} : vector<64x384xf32> to vector<64x128xf32>
    %30 = vector.extract_strided_slice %28 {offsets = [0, 128], sizes = [64, 128], strides = [1, 1]} : vector<64x384xf32> to vector<64x128xf32>
    %31 = vector.extract_strided_slice %28 {offsets = [0, 256], sizes = [64, 128], strides = [1, 1]} : vector<64x384xf32> to vector<64x128xf32>
    %cst_13 = arith.constant dense<0xFF800000> : vector<128xf32>
    %32 = vector.multi_reduction <maximumf>, %30, %cst_13 [0] : vector<64x128xf32> to vector<128xf32>
    %33 = vector.shape_cast %32 : vector<128xf32> to vector<1x128xf32>
    %34 = vector.broadcast %33 : vector<1x128xf32> to vector<64x128xf32>
    %35 = arith.subf %30, %34 : vector<64x128xf32>
    %36 = math.exp %35 : vector<64x128xf32>
    %cst_14 = arith.constant dense<0.000000e+00> : vector<128xf32>
    %37 = vector.multi_reduction <add>, %36, %cst_14 [0] : vector<64x128xf32> to vector<128xf32>
    %38 = vector.shape_cast %37 : vector<128xf32> to vector<1x128xf32>
    %39 = tpu.reciprocal %38 {approx = true} : vector<1x128xf32> -> vector<1x128xf32>
    %40 = vector.broadcast %39 : vector<1x128xf32> to vector<64x128xf32>
    %41 = arith.mulf %36, %40 : vector<64x128xf32>
    %cst_15 = arith.constant dense<0xFF800000> : vector<64xf32>
    %42 = vector.multi_reduction <maximumf>, %29, %cst_15 [1] : vector<64x128xf32> to vector<64xf32>
    %43 = vector.shape_cast %42 : vector<64xf32> to vector<64x1xf32>
    %44 = vector.broadcast %43 : vector<64x1xf32> to vector<64x128xf32>
    %45 = arith.subf %29, %44 : vector<64x128xf32>
    %46 = math.exp %45 : vector<64x128xf32>
    %47 = arith.truncf %46 : vector<64x128xf32> to vector<64x128xbf16>
    %c0_16 = arith.constant 0 : index
    %c0_17 = arith.constant 0 : index
    %48 = vector.load %arg7[%c0_16, %c0_17] : memref<128x128xbf16, #tpu.memory_space<vmem>>, vector<128x128xbf16>
    %cst_18 = arith.constant dense<0.000000e+00> : vector<64x128xf32>
    %49 = tpu.matmul %47, %48, %cst_18 {dimension_numbers = #tpu.dot_dimension_numbers<[1], [0], [0], [1], [0, 0, 1, 1], [], []>} : vector<64x128xbf16>, vector<128x128xbf16>, vector<64x128xf32> -> vector<64x128xf32>
    %50 = tpu.reciprocal %49 {approx = true} : vector<64x128xf32> -> vector<64x128xf32>
    %51 = arith.mulf %46, %50 : vector<64x128xf32>
    %52 = arith.truncf %41 : vector<64x128xf32> to vector<64x128xbf16>
    %53 = arith.truncf %31 : vector<64x128xf32> to vector<64x128xbf16>
    %cst_19 = arith.constant dense<0.000000e+00> : vector<128x128xf32>
    %54 = tpu.matmul %52, %53, %cst_19 {dimension_numbers = #tpu.dot_dimension_numbers<[0], [0], [1], [1], [0, 1, 1, 1], [], []>} : vector<64x128xbf16>, vector<64x128xbf16>, vector<128x128xf32> -> vector<128x128xf32>
    %c0_20 = arith.constant 0 : index
    %c0_21 = arith.constant 0 : index
    %55 = vector.load %arg7[%c0_20, %c0_21] : memref<128x128xbf16, #tpu.memory_space<vmem>>, vector<128x128xbf16>
    %56 = arith.extf %55 : vector<128x128xbf16> to vector<128x128xf32>
    %57 = arith.mulf %54, %56 : vector<128x128xf32>
    %58 = arith.truncf %51 : vector<64x128xf32> to vector<64x128xbf16>
    %59 = arith.truncf %57 : vector<128x128xf32> to vector<128x128xbf16>
    %cst_22 = arith.constant dense<0.000000e+00> : vector<64x128xf32>
    %60 = tpu.matmul %58, %59, %cst_22 {dimension_numbers = #tpu.dot_dimension_numbers<[1], [0], [0], [1], [0, 0, 1, 1], [], []>} : vector<64x128xbf16>, vector<128x128xbf16>, vector<64x128xf32> -> vector<64x128xf32>
    %61 = arith.truncf %60 : vector<64x128xf32> to vector<64x128xbf16>
    %c0_23 = arith.constant 0 : index
    %c0_24 = arith.constant 0 : index
    %62 = vector.load %arg5[%c0_23, %c0_24] : memref<128x128xbf16, #tpu.memory_space<vmem>>, vector<128x128xbf16>
    %cst_25 = arith.constant dense<0.000000e+00> : vector<64x128xf32>
    %63 = tpu.matmul %61, %62, %cst_25 {dimension_numbers = #tpu.dot_dimension_numbers<[1], [0], [0], [1], [0, 0, 1, 1], [], []>} : vector<64x128xbf16>, vector<128x128xbf16>, vector<64x128xf32> -> vector<64x128xf32>
    %c0_26 = arith.constant 0 : index
    %c0_27 = arith.constant 0 : index
    %64 = vector.load %arg6[%c0_26, %c0_27] : memref<1x128xf32, #tpu.memory_space<vmem>>, vector<1x128xf32>
    %65 = vector.broadcast %64 : vector<1x128xf32> to vector<64x128xf32>
    %66 = arith.addf %63, %65 : vector<64x128xf32>
    %67 = arith.addf %1, %66 : vector<64x128xf32>
    %c0_28 = arith.constant 0 : index
    %c0_29 = arith.constant 0 : index
    %68 = vector.load %arg8[%c0_28, %c0_29] : memref<1x128xf32, #tpu.memory_space<vmem>>, vector<1x128xf32>
    %c0_30 = arith.constant 0 : index
    %c0_31 = arith.constant 0 : index
    %69 = vector.load %arg9[%c0_30, %c0_31] : memref<1x128xf32, #tpu.memory_space<vmem>>, vector<1x128xf32>
    %cst_32 = arith.constant dense<0.000000e+00> : vector<64xf32>
    %70 = vector.multi_reduction <add>, %67, %cst_32 [1] : vector<64x128xf32> to vector<64xf32>
    %71 = vector.shape_cast %70 : vector<64xf32> to vector<64x1xf32>
    %cst_33 = arith.constant 1.280000e+02 : f32
    %72 = vector.broadcast %cst_33 : f32 to vector<64x1xf32>
    %73 = arith.divf %71, %72 : vector<64x1xf32>
    %74 = vector.broadcast %73 : vector<64x1xf32> to vector<64x128xf32>
    %75 = arith.subf %67, %74 : vector<64x128xf32>
    %76 = arith.mulf %75, %75 : vector<64x128xf32>
    %cst_34 = arith.constant dense<0.000000e+00> : vector<64xf32>
    %77 = vector.multi_reduction <add>, %76, %cst_34 [1] : vector<64x128xf32> to vector<64xf32>
    %78 = vector.shape_cast %77 : vector<64xf32> to vector<64x1xf32>
    %cst_35 = arith.constant 1.280000e+02 : f32
    %79 = vector.broadcast %cst_35 : f32 to vector<64x1xf32>
    %80 = arith.divf %78, %79 : vector<64x1xf32>
    %81 = vector.broadcast %73 : vector<64x1xf32> to vector<64x128xf32>
    %82 = arith.subf %67, %81 : vector<64x128xf32>
    %cst_36 = arith.constant 9.99999974E-6 : f32
    %83 = vector.broadcast %cst_36 : f32 to vector<64x1xf32>
    %84 = arith.addf %80, %83 : vector<64x1xf32>
    %85 = math.rsqrt %84 : vector<64x1xf32>
    %86 = vector.broadcast %85 : vector<64x1xf32> to vector<64x128xf32>
    %87 = arith.mulf %82, %86 : vector<64x128xf32>
    %88 = vector.broadcast %68 : vector<1x128xf32> to vector<64x128xf32>
    %89 = arith.mulf %87, %88 : vector<64x128xf32>
    %90 = vector.broadcast %69 : vector<1x128xf32> to vector<64x128xf32>
    %91 = arith.addf %89, %90 : vector<64x128xf32>
    %92 = arith.truncf %91 : vector<64x128xf32> to vector<64x128xbf16>
    %c0_37 = arith.constant 0 : index
    %c0_38 = arith.constant 0 : index
    %93 = vector.load %arg10[%c0_37, %c0_38] : memref<128x256xbf16, #tpu.memory_space<vmem>>, vector<128x256xbf16>
    %cst_39 = arith.constant dense<0.000000e+00> : vector<64x256xf32>
    %94 = tpu.matmul %92, %93, %cst_39 {dimension_numbers = #tpu.dot_dimension_numbers<[1], [0], [0], [1], [0, 0, 1, 1], [], []>} : vector<64x128xbf16>, vector<128x256xbf16>, vector<64x256xf32> -> vector<64x256xf32>
    %c0_40 = arith.constant 0 : index
    %c0_41 = arith.constant 0 : index
    %95 = vector.load %arg11[%c0_40, %c0_41] : memref<1x256xf32, #tpu.memory_space<vmem>>, vector<1x256xf32>
    %96 = vector.broadcast %95 : vector<1x256xf32> to vector<64x256xf32>
    %97 = arith.addf %94, %96 : vector<64x256xf32>
    %98 = arith.negf %97 : vector<64x256xf32>
    %99 = math.exp %98 : vector<64x256xf32>
    %cst_42 = arith.constant 1.000000e+00 : f32
    %100 = vector.broadcast %cst_42 : f32 to vector<64x256xf32>
    %101 = arith.addf %100, %99 : vector<64x256xf32>
    %102 = arith.divf %100, %101 : vector<64x256xf32>
    %103 = arith.mulf %97, %102 : vector<64x256xf32>
    %104 = arith.truncf %103 : vector<64x256xf32> to vector<64x256xbf16>
    %c0_43 = arith.constant 0 : index
    %c0_44 = arith.constant 0 : index
    %105 = vector.load %arg12[%c0_43, %c0_44] : memref<256x128xbf16, #tpu.memory_space<vmem>>, vector<256x128xbf16>
    %cst_45 = arith.constant dense<0.000000e+00> : vector<64x128xf32>
    %106 = tpu.matmul %104, %105, %cst_45 {dimension_numbers = #tpu.dot_dimension_numbers<[1], [0], [0], [1], [0, 0, 1, 1], [], []>} : vector<64x256xbf16>, vector<256x128xbf16>, vector<64x128xf32> -> vector<64x128xf32>
    %c0_46 = arith.constant 0 : index
    %c0_47 = arith.constant 0 : index
    %107 = vector.load %arg13[%c0_46, %c0_47] : memref<1x128xf32, #tpu.memory_space<vmem>>, vector<1x128xf32>
    %108 = vector.broadcast %107 : vector<1x128xf32> to vector<64x128xf32>
    %109 = arith.addf %106, %108 : vector<64x128xf32>
    %110 = arith.addf %67, %109 : vector<64x128xf32>
    %c0_48 = arith.constant 0 : index
    %c0_49 = arith.constant 0 : index
    %c0_50 = arith.constant 0 : index
    %111 = vector.load %arg14[%c0_48, %c0_49, %c0_50] : memref<1x64x128xf32, #tpu.memory_space<vmem>>, vector<1x64x128xf32>
    %112 = vector.shape_cast %111 : vector<1x64x128xf32> to vector<64x128xf32>
    %113 = vector.shape_cast %110 : vector<64x128xf32> to vector<1x64x128xf32>
    tpu.vector_store %arg14[%c0_48, %c0_49, %c0_50], %113 {strides = array<i32>} : memref<1x64x128xf32, #tpu.memory_space<vmem>>, vector<1x64x128xf32>,
    return
  }
  func.func @transform_0(%arg0: i32) -> (i32, i32, i32) {
    %c0_i32 = arith.constant 0 : i32
    %c0_i32_0 = arith.constant 0 : i32
    %c0_i32_1 = arith.constant 0 : i32
    return %arg0, %c0_i32, %c0_i32_0 : i32, i32, i32
  }
  func.func @transform_1(%arg0: i32) -> (i32, i32) {
    %c0_i32 = arith.constant 0 : i32
    %c0_i32_0 = arith.constant 0 : i32
    %c0_i32_1 = arith.constant 0 : i32
    return %c0_i32, %c0_i32_0 : i32, i32
  }
  func.func @transform_2(%arg0: i32) -> (i32, i32) {
    %c0_i32 = arith.constant 0 : i32
    %c0_i32_0 = arith.constant 0 : i32
    %c0_i32_1 = arith.constant 0 : i32
    return %c0_i32, %c0_i32_0 : i32, i32
  }
  func.func @transform_3(%arg0: i32) -> (i32, i32) {
    %c0_i32 = arith.constant 0 : i32
    %c0_i32_0 = arith.constant 0 : i32
    %c0_i32_1 = arith.constant 0 : i32
    return %c0_i32, %c0_i32_0 : i32, i32
  }
  func.func @transform_4(%arg0: i32) -> (i32, i32) {
    %c0_i32 = arith.constant 0 : i32
    %c0_i32_0 = arith.constant 0 : i32
    %c0_i32_1 = arith.constant 0 : i32
    return %c0_i32, %c0_i32_0 : i32, i32
  }
  func.func @transform_5(%arg0: i32) -> (i32, i32) {
    %c0_i32 = arith.constant 0 : i32
    %c0_i32_0 = arith.constant 0 : i32
    %c0_i32_1 = arith.constant 0 : i32
    return %c0_i32, %c0_i32_0 : i32, i32
  }
  func.func @transform_6(%arg0: i32) -> (i32, i32) {
    %c0_i32 = arith.constant 0 : i32
    %c0_i32_0 = arith.constant 0 : i32
    %c0_i32_1 = arith.constant 0 : i32
    return %c0_i32, %c0_i32_0 : i32, i32
  }
  func.func @transform_7(%arg0: i32) -> (i32, i32) {
    %c0_i32 = arith.constant 0 : i32
    %c0_i32_0 = arith.constant 0 : i32
    %c0_i32_1 = arith.constant 0 : i32
    return %c0_i32, %c0_i32_0 : i32, i32
  }
  func.func @transform_8(%arg0: i32) -> (i32, i32) {
    %c0_i32 = arith.constant 0 : i32
    %c0_i32_0 = arith.constant 0 : i32
    %c0_i32_1 = arith.constant 0 : i32
    return %c0_i32, %c0_i32_0 : i32, i32
  }
  func.func @transform_9(%arg0: i32) -> (i32, i32) {
    %c0_i32 = arith.constant 0 : i32
    %c0_i32_0 = arith.constant 0 : i32
    %c0_i32_1 = arith.constant 0 : i32
    return %c0_i32, %c0_i32_0 : i32, i32
  }
  func.func @transform_10(%arg0: i32) -> (i32, i32) {
    %c0_i32 = arith.constant 0 : i32
    %c0_i32_0 = arith.constant 0 : i32
    %c0_i32_1 = arith.constant 0 : i32
    return %c0_i32, %c0_i32_0 : i32, i32
  }
  func.func @transform_11(%arg0: i32) -> (i32, i32) {
    %c0_i32 = arith.constant 0 : i32
    %c0_i32_0 = arith.constant 0 : i32
    %c0_i32_1 = arith.constant 0 : i32
    return %c0_i32, %c0_i32_0 : i32, i32
  }
  func.func @transform_12(%arg0: i32) -> (i32, i32) {
    %c0_i32 = arith.constant 0 : i32
    %c0_i32_0 = arith.constant 0 : i32
    %c0_i32_1 = arith.constant 0 : i32
    return %c0_i32, %c0_i32_0 : i32, i32
  }
  func.func @transform_13(%arg0: i32) -> (i32, i32, i32) {
    %c0_i32 = arith.constant 0 : i32
    %c0_i32_0 = arith.constant 0 : i32
    %c0_i32_1 = arith.constant 0 : i32
    return %arg0, %c0_i32, %c0_i32_0 : i32, i32, i32
  }
}

</mosaic_0001>

<bundles_post_ra>
// kernel: transformer_block_forward.1
= control target key start
LH: loop header
LB: loop body
LE: loop exit
PB: predicated region body
PF: predicated region fallthrough
CT: control target
= control target key end

     0   :  { %s3971_s0 = inlined_call_operand.hbm [shape: f32[4,64,128], index: 0, kind: input, shape index: {}]   ;;  %s3972_s1 = inlined_call_operand.vmem [shape: f32[1,128], index: 1, kind: input, shape index: {}]   ;;  %s3973_s2 = inlined_call_operand.vmem [shape: f32[1,128], index: 2, kind: input, shape index: {}]   ;;  %s3974_s3 = inlined_call_operand.hbm [shape: bf16[128,384], index: 3, kind: input, shape index: {}]   ;;  %s3975_s4 = inlined_call_operand.vmem [shape: bf16[128,128], index: 4, kind: input, shape index: {}]   ;;  %s3976_s5 = inlined_call_operand.vmem [shape: f32[1,128], index: 5, kind: input, shape index: {}]   ;;  %s3977_s6 = inlined_call_operand.vmem [shape: bf16[128,128], index: 6, kind: input, shape index: {}]   ;;  %s3978_s7 = inlined_call_operand.vmem [shape: f32[1,128], index: 7, kind: input, shape index: {}]   ;;  %s3979_s8 = inlined_call_operand.vmem [shape: f32[1,128], index: 8, kind: input, shape index: {}]   ;;  %s3980_s9 = inlined_call_operand.hbm [shape: bf16[128,256], index: 9, kind: input, shape index: {}]   ;;  %s3981_s10 = inlined_call_operand.vmem [shape: f32[1,256], index: 10, kind: input, shape index: {}]   ;;  %s3982_s11 = inlined_call_operand.hbm [shape: bf16[256,128], index: 11, kind: input, shape index: {}]   ;;  %s3983_s12 = inlined_call_operand.vmem [shape: f32[1,128], index: 12, kind: input, shape index: {}]   ;;  %s3984_s13 = inlined_call_operand.hbm [shape: f32[4,64,128], index: 13, kind: output, shape index: {}]  }
   0x1   :  { %3995 = sst [smem:[#allocation19_spill]] %s3974_s3 }
   0x2   :  { %3996 = sst [smem:[#allocation20_spill]] %s3980_s9 }
   0x3   :  { %3997 = sst [smem:[#allocation21_spill]] %s3982_s11 }
   0x4   :  { %18 = vsyncpa [#allocation3], 0 }
   0x5   :  { %20 = vsyncpa [#allocation3 + $0x1], 0 }
   0x6   :  { %21 = vsyncpa [#allocation6], 0 }
   0x7   :  { %22 = vsyncpa [#allocation9], 0 }
   0x8   :  { %23 = vsyncpa [#allocation4], 0 }
   0x9   :  { %25 = vsyncpa [#allocation4 + $0x1], 0  ;;  %s3299_s25 = smov 0   ;;  %s3301_s26 = smov 0  }
   0xa   :  { %s3303_s27 = smov 0   ;;  %s3305_s28 = smov 0  }
   0xb LB: > { %3998 = sst [smem:[#allocation15_spill]] %s3209_s27  ;;  %s3320_s29 = sadd.s32 4294967295, %s3213_s28   ;;  %s3213_s28 = sphi %s3305_s28, %s4023_s28   ;;  %s3209_s27 = sphi %s3303_s27, %s4025_s27   ;;  %s3205_s26 = sphi %s3301_s26, %s4027_s26   ;;  %s3201_s25 = sphi %s3299_s25, %s4026_s25  }
   0xc   : > { %s2339_s30 = sadd.s32 4294967294, %s3213_s28   ;;  %p51_p0 = scmp.ne.s32.totalorder %s3205_s26, %s3201_s25 }
   0xd   : > { %p3985_p1 = scmp.eq.s32.totalorder %s3320_s29, 0  ;;  %p333_p3 = scmp.eq.s32.totalorder %s2339_s30, 3 }
   0xe   : > { %p2340_p5 = scmp.ge.s32.totalorder %s3213_s28, 1  ;;  %p340_p7 = scmp.lt.s32.totalorder %s3213_s28, 5 }
   0xf   : > { %p3329_p4 = por %p3985_p1, %p51_p0  ;;  %p3334_p6 = por %p333_p3, %p51_p0 }
  0x10   : > { %p3339_p8 = pnand %p2340_p5, %p340_p7  ;;  %s3215_s17 = smov [#allocation5]  }
  0x11   : > { %s3999_s14 = scalar_select %p3329_p4, 1, 0 }
  0x12   : > { %s4000_s15 = scalar_select %p3334_p6, 1, 0 }
  0x13   : > { %s4002_s16 = scalar_select %p3339_p8, 1, 0 }
  0x14   : > { %4001 = sst [smem:[#allocation16_spill]] %s4000_s15  ;;  %s358_s18 = sshll.u32 %s3215_s17, 4  ;;  %s359_s18 = int_to_ptr.vmem [resolvable:$true] %s358_s18 }
  0x15   : > { %p2715_p9 = pneg %p3339_p8  ;;  %s3216_s20 = smov [#allocation7]  }
  0x16   : > { %s386_s21 = sshll.u32 %s3216_s20, 4  ;;  %s3046_s22 = scalar_lea.vmem %s359_s18, 3072  ;;  %s387_s21 = int_to_ptr.vmem [resolvable:$true] %s386_s21 }
  0x17   : > { %p3347_p10 = pnand %p2715_p9, %p3985_p1  ;;  %p3047_p12 = scmp.ne.s32.totalorder %s359_s18, %s3046_s22 }
  0x18   : > { %p3054_p3 = scmp.lt.s32.totalorder %s359_s18, %s359_s18  ;;  %p3055_p5 = scmp.lt.s32.totalorder %s3046_s22, %s3046_s22 }
  0x19   : > { %p3037_p11 = pneg %p3347_p10 }
  0x1a   : > { %p3056_p7 = por %p3055_p5, %p3054_p3 }
  0x1b   : > { %p3049_p13 = pnand %p3047_p12, %p3037_p11 }
  0x1d   : > { %p3050_p0 = pneg %p3049_p13 }
  0x1f   : > { %p3057_p9 = pnand %p3056_p7, %p3050_p0 }
  0x21   : > { %3060 = shalt.err (!%p3057_p9)
}
  0x22   : > { %s3217_s23 = smov 192   ;;  %s3218_s24 = smov 12  }
  0x23   : > { %s4004_s3 = sld [smem:[#allocation19_spill]]  ;;  %s3072_s20 = scalar_lea.vmem %s387_s21, 2048 }
  0x24   : > { %p3073_p1 = scmp.ne.s32.totalorder %s387_s21, %s3072_s20  ;;  %p3080_p2 = scmp.lt.s32.totalorder %s387_s21, %s387_s21 }
  0x25   : > { %p3081_p6 = scmp.lt.s32.totalorder %s3072_s20, %s3072_s20 }
  0x26   : > { %p3075_p12 = pnand %p3073_p1, %p3037_p11 }
  0x27   : > { %p3082_p3 = por %p3081_p6, %p3080_p2 }
  0x28   : > { %p3076_p13 = pneg %p3075_p12 }
  0x29   : > { %2718 = dma.hbm_to_vmem [thread:$0]  (!%p3347_p10), %s4004_s3, 3072, %s359_s18, [#allocation6], %s3217_s23, %s3217_s23, %s3218_s24  }
  0x2a   : > { %p3083_p0 = pnand %p3082_p3, %p3076_p13 }
  0x2c   : > { %3086 = shalt.err (!%p3083_p0)
}
  0x2d   : > { %s3987_s22 = smov 128   ;;  %s3988_s15 = smov 8  }
  0x2e   : > { %s4005_s9 = sld [smem:[#allocation20_spill]]  ;;  %s3221_s24 = smov [#allocation8]  }
  0x2f   : > { %s402_s30 = sshll.u32 %s3221_s24, 4  ;;  %s403_s30 = int_to_ptr.vmem [resolvable:$true] %s402_s30 }
  0x30   : > { %s3098_s17 = scalar_lea.vmem %s403_s30, 2048  ;;  %p3106_p5 = scmp.lt.s32.totalorder %s403_s30, %s403_s30 }
  0x31   : > { %p3099_p1 = scmp.ne.s32.totalorder %s403_s30, %s3098_s17  ;;  %p3107_p7 = scmp.lt.s32.totalorder %s3098_s17, %s3098_s17 }
  0x33   : > { %p3101_p2 = pnand %p3099_p1, %p3037_p11  ;;  %p3108_p9 = por %p3107_p7, %p3106_p5 }
  0x34   : > { %2721 = dma.hbm_to_vmem [thread:$0]  (!%p3347_p10), %s4005_s9, 2048, %s387_s21, [#allocation6], %s3987_s22, %s3987_s22, %s3988_s15  }
  0x35   : > { %p3102_p6 = pneg %p3101_p2 }
  0x37   : > { %p3109_p12 = pnand %p3108_p9, %p3102_p6 }
  0x39   : > { %3112 = shalt.err (!%p3109_p12)
}
  0x3a   : > { %s3222_s20 = smov 64   ;;  %s3223_s21 = smov 4  }
  0x3b   : > { %s4006_s11 = sld [smem:[#allocation21_spill]]  ;;  %s3381_s24 = sadd.s32 1, %s3213_s28  }
  0x3c   : > { %4007 = sst [smem:[#allocation17_spill]] %s3381_s24  ;;  %s35_s17 = ssub.s32 %s3213_s28, %s3381_s24 }
  0x3d   : > { %s38_s22 = sadd.s32 1, %s3209_s27  ;;  %p36_p11 = scmp.eq.s32.totalorder %s35_s17, 0 }
  0x3e   : > { %p45_p13 = scmp.ne.s32.totalorder %s3209_s27, %s3205_s26  ;;  %p46_p3 = scmp.eq.s32.totalorder %s3213_s28, 0 }
  0x3f   : > { %p2736_p0 = scmp.lt.s32.totalorder %s3213_s28, 4  ;;  %p4009_p2 = scmp.eq.s32.totalorder %s3320_s29, 3 }
  0x40   : > { %s3391_s15 = scalar_select %p36_p11, %s3209_s27, %s38_s22  }
  0x41   : > { %2724 = dma.hbm_to_vmem [thread:$0]  (!%p3347_p10), %s4006_s11, 2048, %s403_s30, [#allocation9], %s3222_s20, %s3222_s20, %s3223_s21  }
  0x42   : > { %4008 = sst [smem:[#allocation18_spill]] %s3391_s15  ;;  %p47_p1 = por %p46_p3, %p45_p13 }
  0x43   : > { %p3395_p6 = por %p4009_p2, %p45_p13  ;;  %s419_s19 = sand.u32 1, %s3209_s27  }
  0x44   : > { %s2461_s18 = sshll.u32 %s3213_s28, 10  ;;  %s2345_s30 = sshll.u32 %s419_s19, 6 }
  0x45   : > { %s4010_s3 = scalar_select %p3395_p6, 1, 0 }
  0x46   : > { %s3404_s23 = scalar_lea.hbm %s3971_s0, %s2461_s18  ;;  %s423_s17 = scalar_lea.vmem [#allocation2], %s2345_s30 }
  0x47   : > { %s430_s22 = sshll.u32 %s423_s17, 4  ;;  %p3406_p10 = pnand %p2736_p0, %p47_p1  ;;  %s3410_s22 = int_to_ptr.vmem [resolvable:$true] %s430_s22 }
  0x48   : > { %s3412_s11 = scalar_lea.sflag [#allocation3], %s419_s19  ;;  %s3113_s15 = scalar_lea.hbm %s3404_s23, 1024 }
  0x49   : > { %p3114_p5 = scmp.ne.s32.totalorder %s3404_s23, %s3113_s15  ;;  %p3115_p7 = pneg %p3406_p10 }
  0x4a   : > { %s3118_s30 = scalar_lea.hbm %s3971_s0, 4096  ;;  %p3119_p11 = scmp.lt.s32.totalorder %s3404_s23, %s3971_s0 }
  0x4b   : > { %p3116_p9 = pnand %p3115_p7, %p3114_p5  ;;  %p3120_p13 = scmp.lt.s32.totalorder %s3118_s30, %s3113_s15 }
  0x4d   : > { %p3117_p12 = pneg %p3116_p9  ;;  %p3121_p3 = por %p3120_p13, %p3119_p11 }
  0x4f   : > { %p3122_p0 = pnand %p3121_p3, %p3117_p12 }
  0x51   : > { %3125 = shalt.err (!%p3122_p0)
}
  0x52   : > { %s3126_s19 = scalar_lea.vmem %s3410_s22, 1024  ;;  %s3224_s27 = smov [#allocation2]  }
  0x53   : > { %p3127_p1 = scmp.ne.s32.totalorder %s3410_s22, %s3126_s19  ;;  %s3131_s24 = sshll.u32 %s3224_s27, 4  ;;  %s3132_s24 = int_to_ptr.vmem [resolvable:$false] %s3131_s24 }
  0x54   : > { %s3133_s18 = scalar_lea.vmem %s3132_s24, 2048  ;;  %p3134_p9 = scmp.lt.s32.totalorder %s3410_s22, %s3132_s24 }
  0x55   : > { %p3129_p2 = pnand %p3127_p1, %p3115_p7  ;;  %p3135_p6 = scmp.lt.s32.totalorder %s3133_s18, %s3126_s19 }
  0x57   : > { %p3130_p5 = pneg %p3129_p2  ;;  %p3136_p4 = por %p3135_p6, %p3134_p9 }
  0x59   : > { %p3137_p8 = pnand %p3136_p4, %p3130_p5 }
  0x5b   : > { %3140 = shalt.err (!%p3137_p8)
}
  0x5c   : > { %s4012_s15 = smov 8   ;;  %s4013_s20 = smov 128  }
  0x5d   : > { %2728 = dma.hbm_to_vmem [thread:$0]  (!%p3406_p10), %s3404_s23, 1024, %s3410_s22, %s3412_s11, %s4013_s20, %s4013_s20, %s4012_s15  }
  0x5e   : > { %p4014_p7 = scmp.ne.s32.totalorder %s4002_s16, 0 }
  0x5f   : > { %s3439_s27 = sand.u32 (!%p4014_p7), 1, %s3205_s26   ;;  %p4015_p4 = scmp.ne.s32.totalorder (!%p4014_p7), %s3999_s14, 0 }
  0x60   : > { %442 = sbr.rel (%p4014_p7) target bundleno = 2281 (0x8e9), region = 72  ;;  %s2349_s24 = sshll.u32 (!%p4014_p7), %s3439_s27, 6 }
  0x61   : > { %s445_s30 = scalar_lea.sflag (!%p4014_p7), [#allocation3], %s3439_s27  ;;  %s3445_s9 = scalar_lea.vmem (!%p4014_p7), [#allocation2], %s2349_s24 }
  0x65   : > { %3184 = dma.done.wait (%p4015_p4), %s445_s30, 1024  }
  0x66   : > { %3186 = vsyncadd (%p4015_p4), %s445_s30, 4294966272  ;;  %p4016_p8 = scmp.eq.s32.totalorder %s3320_s29, 0 }
  0x68   : > { %3188 = dma.done.wait (%p4016_p8), [#allocation6], 5120   ;;  %p4017_p6 = pmov %p4016_p8 }
  0x6a   : > { %3190 = vsyncadd (%p4017_p6), [#allocation6], 4294962176  ;;  %p4018_p10 = pmov %p4017_p6 }
  0x6b   : > { %p4019_p12 = pmov %p4017_p6 }
  0x6c   : > { %3192 = dma.done.wait (%p4018_p10), [#allocation9], 2048  }
  0x6d   : > { %3194 = vsyncadd (%p4019_p12), [#allocation9], 4294965248  ;;  %v504_v0 = vld [vmem:[%s3445_s9] sm:$0xff]  ;;  %v506_v1 = vld [vmem:[%s3445_s9 + $0x10] sm:$0xff]  ;;  %v3225_v62 = vmov 0   ;;  %vm1205_vm0 = vcmask 523264  }
  0x6e   : > { %514 = vadd.xlane.f32.xlu0 %v504_v0  ;;  %518 = vadd.xlane.f32.xlu1 %v506_v1  ;;  %v505_v2 = vld [vmem:[%s3445_s9 + $0x8] sm:$0xff]  ;;  %v507_v3 = vld [vmem:[%s3445_s9 + $0x18] sm:$0xff]  ;;  %v508_v4 = vld [vmem:[%s3445_s9 + $0x20] sm:$0xff]  ;;  %s3905_s15 = scalar_lea.vmem [#allocation10], %s2349_s24  ;;  %s2462_s24 = sshll.u32 %s3320_s29, 10 }
  0x6f   : > { %v509_v5 = vld [vmem:[%s3445_s9 + $0x28] sm:$0xff]  ;;  %v510_v6 = vld [vmem:[%s3445_s9 + $0x30] sm:$0xff]  ;;  %v511_v7 = vld [vmem:[%s3445_s9 + $0x38] sm:$0xff]  ;;  %827 = vmatprep.mubr.bf16.mxu0 %v3225_v62  ;;  %s2237_s20 = sshll.u32 %s3905_s15, 4  ;;  %s3925_s14 = scalar_lea.hbm %s3984_s13, %s2462_s24  ;;  %s3927_s20 = int_to_ptr.vmem [resolvable:$true] %s2237_s20 }
  0x70   : > { %v2785_v8 = vld [vmem:[#allocation5 + $0xac] ss:$12 sps:$4 sm:$0xff]   ;;  %v2787_v9 = vld [vmem:[#allocation5 + $0xa8] ss:$12 sps:$4 sm:$0xff]   ;;  %v2790_v42 = vld [vmem:[#allocation5 + $0xb0] ss:$12 sps:$4 sm:$0xff]  }
  0x71   : > { %795 = vmatprep.subr.bf16.mxu0 %v2785_v8  ;;  %v2788_v41 = vld [vmem:[#allocation5 + $0x94] ss:$12 sps:$4 sm:$0xff]   ;;  %v2791_v43 = vld [vmem:[#allocation5 + $0x90] ss:$12 sps:$4 sm:$0xff]   ;;  %2563 = vmatprep.subr.bf16.mxu1 %v2790_v42  ;;  %v2794_v46 = vld [vmem:[#allocation5 + $0x98] ss:$12 sps:$4 sm:$0xff]  }
  0x72   : > { %516 = vadd.xlane.f32.xlu0 %v505_v2  ;;  %520 = vadd.xlane.f32.xlu1 %v507_v3  ;;  %v2792_v45 = vld [vmem:[#allocation5 + $0x7c] ss:$12 sps:$4 sm:$0xff]   ;;  %v2795_v47 = vld [vmem:[#allocation5 + $0x78] ss:$12 sps:$4 sm:$0xff]   ;;  %v2798_v49 = vld [vmem:[#allocation5 + $0x80] ss:$12 sps:$4 sm:$0xff]  }
  0x73   : > { %796 = vmatpush1.bf16.msra.mxu0 %v2787_v9  ;;  %2564 = vmatpush3.bf16.msra.mxu1 %v2790_v42  ;;  %v2796_v48 = vld [vmem:[#allocation5 + $0x64] ss:$12 sps:$4 sm:$0xff]   ;;  %v2799_v50 = vld [vmem:[#allocation5 + $0x60] ss:$12 sps:$4 sm:$0xff]   ;;  %v2802_v52 = vld [vmem:[#allocation5 + $0x68] ss:$12 sps:$4 sm:$0xff]  }
  0x74   : > { %797 = vmatprep.subr.bf16.mxu0 %v2788_v41  ;;  %2565 = vmatprep.subr.bf16.mxu1 %v2794_v46  ;;  %v2800_v51 = vld [vmem:[#allocation5 + $0x4c] ss:$12 sps:$4 sm:$0xff]   ;;  %v2803_v53 = vld [vmem:[#allocation5 + $0x48] ss:$12 sps:$4 sm:$0xff]   ;;  %v2806_v55 = vld [vmem:[#allocation5 + $0x50] ss:$12 sps:$4 sm:$0xff]  }
  0x75   : > { %v2804_v54 = vld [vmem:[#allocation5 + $0x34] ss:$12 sps:$4 sm:$0xff]   ;;  %v2807_v56 = vld [vmem:[#allocation5 + $0x30] ss:$12 sps:$4 sm:$0xff]   ;;  %v2810_v58 = vld [vmem:[#allocation5 + $0x38] ss:$12 sps:$4 sm:$0xff]  }
  0x76   : > { %522 = vadd.xlane.f32.xlu0 %v508_v4  ;;  %524 = vadd.xlane.f32.xlu1 %v509_v5  ;;  %v2808_v57 = vld [vmem:[#allocation5 + $0x1c] ss:$12 sps:$4 sm:$0xff]   ;;  %v2811_v59 = vld [vmem:[#allocation5 + $0x18] ss:$12 sps:$4 sm:$0xff]   ;;  %v2814_v61 = vld [vmem:[#allocation5 + $0x20] ss:$12 sps:$4 sm:$0xff]  }
  0x77   : > { %798 = vmatpush1.bf16.msra.mxu0 %v2791_v43  ;;  %2566 = vmatpush3.bf16.msra.mxu1 %v2794_v46  ;;  %v2812_v60 = vld [vmem:[#allocation5 + $0x4] ss:$12 sps:$4 sm:$0xff]   ;;  %v2815_v63 = vld [vmem:[#allocation5] ss:$12 sps:$4 sm:$0xff]   ;;  %s3141_s16 = scalar_lea.vmem %s3927_s20, 1024  ;;  %p4020_p13 = scmp.ne.s32.totalorder %s4010_s3, 0 }
  0x78   : > { %799 = vmatprep.subr.bf16.mxu0 %v2792_v45  ;;  %2567 = vmatprep.subr.bf16.mxu1 %v2798_v49  ;;  %p3142_p11 = scmp.ne.s32.totalorder %s3927_s20, %s3141_s16  ;;  %s3226_s29 = smov [#allocation10]  }
  0x79   : > { %s3145_s23 = sshll.u32 %s3226_s29, 4  ;;  %s3146_s23 = int_to_ptr.vmem [resolvable:$false] %s3145_s23 }
  0x7a   : > { %526 = vadd.xlane.f32.xlu0 %v510_v6  ;;  %528 = vadd.xlane.f32.xlu1 %v511_v7  ;;  %p3143_p3 = pnand %p3142_p11, %p4020_p13  ;;  %s3147_s22 = scalar_lea.vmem %s3146_s23, 2048 }
  0x7b   : > { %800 = vmatpush1.bf16.msra.mxu0 %v2795_v47  ;;  %2568 = vmatpush3.bf16.msra.mxu1 %v2798_v49  ;;  %p3148_p1 = scmp.lt.s32.totalorder %s3927_s20, %s3146_s23  ;;  %p3149_p2 = scmp.lt.s32.totalorder %s3147_s22, %s3141_s16 }
  0x7c   : > { %801 = vmatprep.subr.bf16.mxu0 %v2796_v48  ;;  %2569 = vmatprep.subr.bf16.mxu1 %v2802_v52  ;;  %p3144_p0 = pneg %p3143_p3 }
  0x7d   : > { %p3150_p5 = por %p3149_p2, %p3148_p1 }
  0x7f   : > { %802 = vmatpush1.bf16.msra.mxu0 %v2799_v50  ;;  %2570 = vmatpush3.bf16.msra.mxu1 %v2802_v52  ;;  %p3151_p9 = pnand %p3150_p5, %p3144_p0 }
  0x80   : > { %803 = vmatprep.subr.bf16.mxu0 %v2800_v51  ;;  %2571 = vmatprep.subr.bf16.mxu1 %v2806_v55 }
  0x83   : > { %804 = vmatpush1.bf16.msra.mxu0 %v2803_v53  ;;  %2572 = vmatpush3.bf16.msra.mxu1 %v2806_v55 }
  0x84   : > { %805 = vmatprep.subr.bf16.mxu0 %v2804_v54  ;;  %2573 = vmatprep.subr.bf16.mxu1 %v2810_v58 }
  0x87   : > { %806 = vmatpush1.bf16.msra.mxu0 %v2807_v56  ;;  %2574 = vmatpush3.bf16.msra.mxu1 %v2810_v58 }
  0x88   : > { %807 = vmatprep.subr.bf16.mxu0 %v2808_v57  ;;  %2575 = vmatprep.subr.bf16.mxu1 %v2814_v61 }
  0x8b   : > { %808 = vmatpush1.bf16.msra.mxu0 %v2811_v59  ;;  %2576 = vmatpush3.bf16.msra.mxu1 %v2814_v61 }
  0x8c   : > { %809 = vmatprep.subr.bf16.mxu0 %v2812_v60 }
  0x8f   : > { %810 = vmatpush1.bf16.msra.mxu0 %v2815_v63 }
  0xf7   : > { %v515_v10 = vpop.xlane.xlu0 %514  ;;  %v519_v11 = vpop.xlane.xlu1 %518 }
  0xf8   : > { %v531_v12 = vmul.f32 0.0078125, %v515_v10  ;;  %v533_v13 = vmul.f32 0.0078125, %v519_v11 }
  0xfa   : > { %v3467_v14 = vsub.f32 %v504_v0, %v531_v12  ;;  %v3469_v15 = vsub.f32 %v506_v1, %v533_v13  ;;  %v2816_v0 = vld [vmem:[#allocation5 + $0x8] ss:$12 sps:$4 sm:$0xff]  }
  0xfb   : > { %v517_v16 = vpop.xlane.xlu0 %516  ;;  %v521_v17 = vpop.xlane.xlu1 %520  ;;  %2577 = vmatprep.subr.bf16.mxu1 %v2816_v0 }
  0xfc   : > { %v532_v18 = vmul.f32 0.0078125, %v517_v16  ;;  %v547_v19 = vmul.f32 %v3467_v14, %v3467_v14  ;;  %v534_v20 = vmul.f32 0.0078125, %v521_v17  ;;  %v549_v23 = vmul.f32 %v3469_v15, %v3469_v15  ;;  %2578 = vmatpush3.bf16.msra.mxu1 %v2816_v0 }
  0xfe   : > { %v3473_v21 = vsub.f32 %v505_v2, %v532_v18  ;;  %555 = vadd.xlane.f32.xlu0 %v547_v19  ;;  %v3475_v22 = vsub.f32 %v507_v3, %v534_v20 }
  0xff   : > { %v523_v24 = vpop.xlane.xlu0 %522  ;;  %v525_v25 = vpop.xlane.xlu1 %524 }
 0x100   : > { %v535_v26 = vmul.f32 0.0078125, %v523_v24  ;;  %v548_v27 = vmul.f32 %v3473_v21, %v3473_v21  ;;  %v536_v28 = vmul.f32 0.0078125, %v525_v25  ;;  %v550_v31 = vmul.f32 %v3475_v22, %v3475_v22 }
 0x102   : > { %v3481_v29 = vsub.f32 %v508_v4, %v535_v26  ;;  %559 = vadd.xlane.f32.xlu0 %v549_v23  ;;  %557 = vadd.xlane.f32.xlu1 %v548_v27  ;;  %v3483_v30 = vsub.f32 %v509_v5, %v536_v28 }
 0x103   : > { %v527_v32 = vpop.xlane.xlu0 %526  ;;  %v529_v33 = vpop.xlane.xlu1 %528 }
 0x104   : > { %v537_v34 = vmul.f32 0.0078125, %v527_v32  ;;  %v551_v35 = vmul.f32 %v3481_v29, %v3481_v29  ;;  %v538_v36 = vmul.f32 0.0078125, %v529_v33  ;;  %v552_v39 = vmul.f32 %v3483_v30, %v3483_v30  ;;  %v2354_v33 = vld [vmem:[%s3972_s1] ss:$0 sm:$0xff] }
 0x106   : > { %v3489_v37 = vsub.f32 %v510_v6, %v537_v34  ;;  %561 = vadd.xlane.f32.xlu1 %v550_v31  ;;  %563 = vadd.xlane.f32.xlu0 %v551_v35  ;;  %v3491_v38 = vsub.f32 %v511_v7, %v538_v36 }
 0x108   : > { %v553_v40 = vmul.f32 %v3489_v37, %v3489_v37  ;;  %v554_v44 = vmul.f32 %v3491_v38, %v3491_v38 }
 0x10a   : > { %565 = vadd.xlane.f32.xlu1 %v552_v39  ;;  %567 = vadd.xlane.f32.xlu0 %v553_v40  ;;  %v2355_v40 = vld [vmem:[%s3973_s2] ss:$0 sm:$0xff] }
 0x10e   : > { %569 = vadd.xlane.f32.xlu1 %v554_v44 }
 0x187   : > { %v556_v1 = vpop.xlane.xlu0 %555 }
 0x188   : > { %v571_v2 = vmul.f32 0.0078125, %v556_v1 }
 0x18a   : > { %v579_v3 = vadd.f32 1e-05, %v571_v2 }
 0x18b   : > { %v558_v4 = vpop.xlane.xlu1 %557  ;;  %v560_v5 = vpop.xlane.xlu0 %559 }
 0x18c   : > { %2881 = vrsqrt.f32 %v579_v3  ;;  %v572_v6 = vmul.f32 0.0078125, %v558_v4  ;;  %v573_v7 = vmul.f32 0.0078125, %v560_v5 }
 0x18e   : > { %v580_v8 = vadd.f32 1e-05, %v572_v6  ;;  %v581_v9 = vadd.f32 1e-05, %v573_v7 }
 0x18f   : > { %v562_v10 = vpop.xlane.xlu1 %561  ;;  %v564_v11 = vpop.xlane.xlu0 %563 }
 0x190   : > { %2883 = vrsqrt.f32 %v580_v8  ;;  %v574_v12 = vmul.f32 0.0078125, %v562_v10  ;;  %v575_v13 = vmul.f32 0.0078125, %v564_v11 }
 0x191   : > { %2885 = vrsqrt.f32 %v581_v9 }
 0x192   : > { %v582_v16 = vadd.f32 1e-05, %v574_v12  ;;  %v583_v17 = vadd.f32 1e-05, %v575_v13 }
 0x193   : > { %v566_v18 = vpop.xlane.xlu1 %565  ;;  %v568_v19 = vpop.xlane.xlu0 %567 }
 0x194   : > { %2887 = vrsqrt.f32 %v582_v16  ;;  %v576_v20 = vmul.f32 0.0078125, %v566_v18  ;;  %v577_v23 = vmul.f32 0.0078125, %v568_v19  ;;  %v3540_v16 = vld [vmem:[%s3977_s6 + $0x38] sm:$0xff]  }
 0x195   : > { %2889 = vrsqrt.f32 %v583_v17  ;;  %2587 = vmatprep.subr.bf16.mxu0 %v3540_v16 }
 0x196   : > { %v584_v24 = vadd.f32 1e-05, %v576_v20  ;;  %v585_v25 = vadd.f32 1e-05, %v577_v23 }
 0x197   : > { %v570_v26 = vpop.xlane.xlu1 %569 }
 0x198   : > { %2891 = vrsqrt.f32 %v584_v24  ;;  %v578_v27 = vmul.f32 0.0078125, %v570_v26 }
 0x199   : > { %v2882_v28 = vpop.eup %2881  ;;  %2893 = vrsqrt.f32 %v585_v25  ;;  %v3552_v25 = vld [vmem:[%s3977_s6 + $0x30] sm:$0xff]  }
 0x19a   : > { %v586_v31 = vadd.f32 1e-05, %v578_v27  ;;  %v595_v32 = vmul.f32 %v2882_v28, %v3467_v14 }
 0x19c   : > { %2895 = vrsqrt.f32 %v586_v31  ;;  %v609_v39 = vmul.f32 %v2354_v33, %v595_v32  ;;  %v3564_v31 = vld [vmem:[%s3977_s6 + $0x28] sm:$0xff]  }
 0x19d   : > { %v2884_v34 = vpop.eup %2883 }
 0x19e   : > { %v2886_v35 = vpop.eup %2885  ;;  %v596_v36 = vmul.f32 %v2884_v34, %v3473_v21  ;;  %v623_v45 = vadd.f32 %v2355_v40, %v609_v39 }
 0x19f   : > { %v597_v41 = vmul.f32 %v2886_v35, %v3469_v15  ;;  %v3574_v35 = vld [vmem:[%s3977_s6 + $0x20] sm:$0xff]  }
 0x1a0   : > { %v610_v42 = vmul.f32 %v2354_v33, %v596_v36 }
 0x1a1   : > { %v2888_v43 = vpop.eup %2887  ;;  %v611_v44 = vmul.f32 %v2354_v33, %v597_v41 }
 0x1a2   : > { %v2890_v14 = vpop.eup %2889  ;;  %v624_v46 = vadd.f32 %v2355_v40, %v610_v42  ;;  %v598_v47 = vmul.f32 %v2888_v43, %v3475_v22 }
 0x1a3   : > { %v599_v48 = vmul.f32 %v2890_v14, %v3481_v29  ;;  %v625_v51 = vadd.f32 %v2355_v40, %v611_v44  ;;  %v3590_v44 = vld [vmem:[%s3977_s6 + $0x18] sm:$0xff]  }
 0x1a4   : > { %v631_v49 = vpack.c.bf16 %v624_v46, %v623_v45  ;;  %v612_v50 = vmul.f32 %v2354_v33, %v598_v47  ;;  %v3597_v47 = vld [vmem:[%s3977_s6 + $0x10] sm:$0xff]  }
 0x1a5   : > { %v2892_v21 = vpop.eup %2891  ;;  %v613_v54 = vmul.f32 %v2354_v33, %v599_v48 }
 0x1a6   : > { %v2894_v52 = vpop.eup %2893  ;;  %828 = vmatmul.mubr.bf16.vlgmr.msra.gmra.mxu0 %v631_v49  ;;  %2579 = vmatprep.mubr.bf16.mxu1 %v631_v49  ;;  %v626_v53 = vadd.f32 %v2355_v40, %v612_v50  ;;  %v600_v15 = vmul.f32 %v2892_v21, %v3483_v30  ;;  %v3604_v50 = vld [vmem:[%s3977_s6 + $0x8] sm:$0xff]  }
 0x1a7   : > { %837 = vmatprep.mubr.bf16.mxu0 %v3225_v62  ;;  %v601_v55 = vmul.f32 %v2894_v52, %v3489_v37  ;;  %v627_v29 = vadd.f32 %v2355_v40, %v613_v54  ;;  %2588 = vmatpush3.bf16.msra.mxu0 %v3540_v16  ;;  %v3611_v52 = vld [vmem:[%s3977_s6] sm:$0xff]  }
 0x1a8   : > { %v632_v56 = vpack.c.bf16 %v626_v53, %v625_v51  ;;  %v614_v57 = vmul.f32 %v2354_v33, %v600_v15  ;;  %2589 = vmatprep.subr.bf16.mxu0 %v3552_v25 }
 0x1a9   : > { %v2896_v22 = vpop.eup %2895  ;;  %v615_v60 = vmul.f32 %v2354_v33, %v601_v55 }
 0x1aa   : > { %2580 = vmatmul.mubr.bf16.vlgmr.msra.gmra.mxu1 %v632_v56  ;;  %v628_v58 = vadd.f32 %v2355_v40, %v614_v57  ;;  %v602_v59 = vmul.f32 %v2896_v22, %v3491_v38 }
 0x1ab   : > { %v629_v0 = vadd.f32 %v2355_v40, %v615_v60  ;;  %2590 = vmatpush3.bf16.msra.mxu0 %v3552_v25 }
 0x1ac   : > { %v633_v61 = vpack.c.bf16 %v628_v58, %v627_v29  ;;  %v616_v63 = vmul.f32 %v2354_v33, %v602_v59  ;;  %2591 = vmatprep.subr.bf16.mxu0 %v3564_v31 }
 0x1ae   : > { %838 = vmatmul.mubr.bf16.gmra.mxu0 %v632_v56  ;;  %2583 = vmatprep.mubr.bf16.mxu1 %v633_v61  ;;  %v630_v30 = vadd.f32 %v2355_v40, %v616_v63 }
 0x1af   : > { %847 = vmatprep.mubr.bf16.mxu0 %v3225_v62  ;;  %2592 = vmatpush3.bf16.msra.mxu0 %v3564_v31 }
 0x1b0   : > { %v634_v1 = vpack.c.bf16 %v630_v30, %v629_v0  ;;  %2593 = vmatprep.subr.bf16.mxu0 %v3574_v35 }
 0x1b2   : > { %2584 = vmatmul.mubr.bf16.gmra.mxu1 %v634_v1 }
 0x1b3   : > { %2594 = vmatpush3.bf16.msra.mxu0 %v3574_v35 }
 0x1b4   : > { %2595 = vmatprep.subr.bf16.mxu0 %v3590_v44 }
 0x1b6   : > { %848 = vmatmul.mubr.bf16.gmra.mxu0 %v633_v61 }
 0x1b7   : > { %857 = vmatprep.mubr.bf16.mxu0 %v3225_v62  ;;  %2596 = vmatpush3.bf16.msra.mxu0 %v3590_v44 }
 0x1b8   : > { %2597 = vmatprep.subr.bf16.mxu0 %v3597_v47 }
 0x1bb   : > { %2598 = vmatpush3.bf16.msra.mxu0 %v3597_v47 }
 0x1bc   : > { %2599 = vmatprep.subr.bf16.mxu0 %v3604_v50 }
 0x1be   : > { %858 = vmatmul.mubr.bf16.gmra.mxu0 %v634_v1 }
 0x1bf   : > { %2600 = vmatpush3.bf16.msra.mxu0 %v3604_v50 }
 0x1c0   : > { %2601 = vmatprep.subr.bf16.mxu0 %v3611_v52 }
 0x1c3   : > { %2602 = vmatpush3.bf16.msra.mxu0 %v3611_v52 }
 0x266   : > { %v3517_v37 = vpop.f32.mrf.mxu0 }
 0x267   : > { %992 = vmax.xlane.f32.xlu0 %v3517_v37 }
 0x268   : > { %v3520_v38 = vpop.f32.mrf.mxu0 }
 0x26a   : > { %v3522_v2 = vpop.f32.mrf.mxu0  ;;  %v2581_v3 = vpop.f32.mrf.mxu1 }
 0x26b   : > { %994 = vmax.xlane.f32.xlu1 %v3522_v2 }
 0x26c   : > { %v3525_v4 = vpop.f32.mrf.mxu0  ;;  %v902_v5 = vpop.f32.mrf.mxu1 }
 0x26e   : > { %v3527_v6 = vpop.f32.mrf.mxu0  ;;  %v2582_v7 = vpop.f32.mrf.mxu1 }
 0x26f   : > { %996 = vmax.xlane.f32.xlu0 %v3527_v6  ;;  %v1186_v28 = vpack.c.bf16 %v2582_v7, %v2581_v3 }
 0x270   : > { %v3530_v8 = vpop.f32.mrf.mxu0  ;;  %v905_v9 = vpop.f32.mrf.mxu1 }
 0x271   : > { %v1185_v34 = vpack.c.bf16 %v905_v9, %v902_v5 }
 0x272   : > { %v3532_v10 = vpop.f32.mrf.mxu0  ;;  %v2585_v11 = vpop.f32.mrf.mxu1 }
 0x273   : > { %998 = vmax.xlane.f32.xlu1 %v3532_v10 }
 0x274   : > { %v3535_v12 = vpop.f32.mrf.mxu0  ;;  %v918_v13 = vpop.f32.mrf.mxu1 }
 0x276   : > { %v3542_v17 = vpop.f32.mrf.mxu0  ;;  %v2586_v18 = vpop.f32.mrf.mxu1 }
 0x277   : > { %v1188_v19 = vpack.c.bf16 %v2586_v18, %v2585_v11  ;;  %1000 = vmax.xlane.f32.xlu1 %v3542_v17 }
 0x278   : > { %v3545_v20 = vpop.f32.mrf.mxu0  ;;  %v921_v23 = vpop.f32.mrf.mxu1 }
 0x279   : > { %v1187_v24 = vpack.c.bf16 %v921_v23, %v918_v13  ;;  %2611 = vmatprep.subr.bf16.mxu1 %v1188_v19  ;;  %v933_v41 = vmax.f32 %v3520_v38, %v3545_v20 }
 0x27a   : > { %v3554_v26 = vpop.f32.mrf.mxu0  ;;  %2612 = vmatpush3.bf16.msra.mxu1 %v1188_v19 }
 0x27b   : > { %1002 = vmax.xlane.f32.xlu1 %v3554_v26  ;;  %2613 = vmatprep.subr.bf16.mxu1 %v1187_v24 }
 0x27c   : > { %v3557_v27 = vpop.f32.mrf.mxu0 }
 0x27d   : > { %v934_v39 = vmax.f32 %v3525_v4, %v3557_v27 }
 0x27e   : > { %v3566_v32 = vpop.f32.mrf.mxu0  ;;  %2614 = vmatpush3.bf16.msra.mxu1 %v1187_v24 }
 0x27f   : > { %2615 = vmatprep.subr.bf16.mxu1 %v1186_v28  ;;  %1004 = vmax.xlane.f32.xlu1 %v3566_v32  ;;  %v937_v14 = vmax.f32 %v933_v41, %v934_v39 }
 0x280   : > { %v861_v33 = vpop.f32.mrf.mxu0 }
 0x281   : > { %v935_v42 = vmax.f32 %v3530_v8, %v861_v33 }
 0x282   : > { %v3576_v36 = vpop.f32.mrf.mxu0  ;;  %2616 = vmatpush3.bf16.msra.mxu1 %v1186_v28 }
 0x283   : > { %2617 = vmatprep.subr.bf16.mxu1 %v1185_v34  ;;  %1006 = vmax.xlane.f32.xlu1 %v3576_v36 }
 0x284   : > { %v865_v40 = vpop.f32.mrf.mxu0 }
 0x285   : > { %v936_v43 = vmax.f32 %v3535_v12, %v865_v40 }
 0x286   : > { %2618 = vmatpush3.bf16.msra.mxu1 %v1185_v34 }
 0x287   : > { %v938_v45 = vmax.f32 %v935_v42, %v936_v43 }
 0x289   : > { %v939_v46 = vmax.f32 %v937_v14, %v938_v45 }
 0x28b   : > { %v940_v48 = vrot.slane %v939_v46, 4 }
 0x28d   : > { %v941_v49 = vmax.f32 %v939_v46, %v940_v48 }
 0x28f   : > { %v942_v21 = vrot.slane %v941_v49, 2 }
 0x291   : > { %v943_v51 = vmax.f32 %v941_v49, %v942_v21 }
 0x293   : > { %v944_v53 = vrot.slane %v943_v51, 1 }
 0x295   : > { %v945_v15 = vmax.f32 %v943_v51, %v944_v53 }
 0x297   : > { %v946_v54 = vsub.f32 %v3520_v38, %v945_v15  ;;  %v947_v55 = vsub.f32 %v3525_v4, %v945_v15  ;;  %v948_v56 = vsub.f32 %v3530_v8, %v945_v15  ;;  %v949_v57 = vsub.f32 %v3535_v12, %v945_v15 }
 0x298   : > { %v950_v58 = vsub.f32 %v3545_v20, %v945_v15  ;;  %v951_v60 = vsub.f32 %v3557_v27, %v945_v15  ;;  %v952_v63 = vsub.f32 %v861_v33, %v945_v15  ;;  %v953_v30 = vsub.f32 %v865_v40, %v945_v15 }
 0x299   : > { %v954_v22 = vmul.f32 1.442695, %v946_v54  ;;  %v956_v29 = vmul.f32 1.442695, %v947_v55  ;;  %v958_v59 = vmul.f32 1.442695, %v948_v56 }
 0x29a   : > { %v960_v61 = vmul.f32 1.442695, %v949_v57  ;;  %v962_v0 = vmul.f32 1.442695, %v950_v58  ;;  %v964_v1 = vmul.f32 1.442695, %v951_v60 }
 0x29b   : > { %2897 = vpow2.f32 %v954_v22  ;;  %v966_v38 = vmul.f32 1.442695, %v952_v63  ;;  %v968_v3 = vmul.f32 1.442695, %v953_v30 }
 0x29c   : > { %2899 = vpow2.f32 %v956_v29 }
 0x29d   : > { %2901 = vpow2.f32 %v958_v59 }
 0x29e   : > { %2903 = vpow2.f32 %v960_v61 }
 0x29f   : > { %2905 = vpow2.f32 %v962_v0 }
 0x2a0   : > { %2907 = vpow2.f32 %v964_v1 }
 0x2a1   : > { %2909 = vpow2.f32 %v966_v38 }
 0x2a2   : > { %2911 = vpow2.f32 %v968_v3 }
 0x2a8   : > { %v2898_v4 = vpop.eup %2897 }
 0x2a9   : > { %v2900_v5 = vpop.eup %2899 }
 0x2aa   : > { %v970_v7 = vadd.f32 %v2900_v5, %v2898_v4  ;;  %v2902_v8 = vpop.eup %2901 }
 0x2ab   : > { %v2904_v11 = vpop.eup %2903 }
 0x2ac   : > { %v971_v9 = vadd.f32 %v2902_v8, %v970_v7  ;;  %v2906_v13 = vpop.eup %2905 }
 0x2ad   : > { %v2908_v19 = vpop.eup %2907 }
 0x2ae   : > { %v972_v12 = vadd.f32 %v2904_v11, %v971_v9  ;;  %v2910_v23 = vpop.eup %2909 }
 0x2af   : > { %v2912_v27 = vpop.eup %2911 }
 0x2b0   : > { %v973_v18 = vadd.f32 %v2906_v13, %v972_v12 }
 0x2b2   : > { %v974_v20 = vadd.f32 %v2908_v19, %v973_v18 }
 0x2b4   : > { %v975_v24 = vadd.f32 %v2910_v23, %v974_v20 }
 0x2b6   : > { %v976_v28 = vadd.f32 %v2912_v27, %v975_v24 }
 0x2b8   : > { %v977_v33 = vrot.slane %v976_v28, 4 }
 0x2ba   : > { %v978_v34 = vadd.f32 %v977_v33, %v976_v28 }
 0x2bc   : > { %v979_v39 = vrot.slane %v978_v34, 2 }
 0x2be   : > { %v980_v40 = vadd.f32 %v979_v39, %v978_v34 }
 0x2c0   : > { %v981_v41 = vrot.slane %v980_v40, 1 }
 0x2c2   : > { %v982_v42 = vadd.f32 %v981_v41, %v980_v40 }
 0x2c4   : > { %2913 = vrcp.f32 %v982_v42 }
 0x2d1   : > { %v2914_v43 = vpop.eup %2913 }
 0x2d2   : > { %v984_v14 = vmul.f32 %v2914_v43, %v2898_v4  ;;  %v985_v45 = vmul.f32 %v2914_v43, %v2900_v5  ;;  %v986_v48 = vmul.f32 %v2914_v43, %v2902_v8  ;;  %v987_v49 = vmul.f32 %v2914_v43, %v2904_v11 }
 0x2d3   : > { %v988_v51 = vmul.f32 %v2914_v43, %v2906_v13  ;;  %v989_v53 = vmul.f32 %v2914_v43, %v2908_v19  ;;  %v990_v54 = vmul.f32 %v2914_v43, %v2910_v23  ;;  %v991_v55 = vmul.f32 %v2914_v43, %v2912_v27 }
 0x2d4   : > { %v1181_v46 = vpack.c.bf16 %v985_v45, %v984_v14  ;;  %v1182_v21 = vpack.c.bf16 %v987_v49, %v986_v48  ;;  %v2825_v45 = vld [vmem:[%s3975_s4 + $0x38] sm:$0xff]   ;;  %v2827_v48 = vld [vmem:[%s3975_s4 + $0x28] sm:$0xff]   ;;  %v2828_v49 = vld [vmem:[%s3975_s4 + $0x20] sm:$0xff]  }
 0x2d5   : > { %v1183_v15 = vpack.c.bf16 %v989_v53, %v988_v51  ;;  %v1184_v56 = vpack.c.bf16 %v991_v55, %v990_v54  ;;  %2659 = vmatprep.subr.bf16.mxu0 %v2825_v45  ;;  %v2829_v51 = vld [vmem:[%s3975_s4 + $0x18] sm:$0xff]   ;;  %v2830_v54 = vld [vmem:[%s3975_s4 + $0x10] sm:$0xff]  }
 0x2d6   : > { %1189 = vxpose.xlu0.c.b16.start [1/4] (short) %v1181_v46, 128  ;;  %v2826_v46 = vld [vmem:[%s3975_s4 + $0x30] sm:$0xff]  }
 0x2da   : > { %1190 = vxpose.xlu0.c.b16.cont [2/4] (short) %v1182_v21, 128 }
 0x2de   : > { %1191 = vxpose.xlu0.c.b16.cont [3/4] (short) %v1183_v15, 128 }
 0x2e2   : > { %1192 = vxpose.xlu0.c.b16.end [4/4] (short) %v1184_v56, 128 }
 0x2f0   : > { %v993_v57 = vpop.xlane.xlu0 %992 }
 0x2f1   : > { %v1008_v22 = vsub.f32 %v3517_v37, %v993_v57 }
 0x2f3   : > { %v1016_v29 = vmul.f32 1.442695, %v1008_v22 }
 0x2f4   : > { %v995_v58 = vpop.xlane.xlu1 %994 }
 0x2f5   : > { %v1009_v59 = vsub.f32 %v3522_v2, %v995_v58  ;;  %2915 = vpow2.f32 %v1016_v29 }
 0x2f7   : > { %v1018_v60 = vmul.f32 1.442695, %v1009_v59 }
 0x2f8   : > { %v997_v61 = vpop.xlane.xlu0 %996 }
 0x2f9   : > { %2917 = vpow2.f32 %v1018_v60  ;;  %v1010_v63 = vsub.f32 %v3527_v6, %v997_v61 }
 0x2fb   : > { %v1020_v0 = vmul.f32 1.442695, %v1010_v63 }
 0x2fc   : > { %v999_v30 = vpop.xlane.xlu1 %998 }
 0x2fd   : > { %v1011_v1 = vsub.f32 %v3532_v10, %v999_v30  ;;  %2919 = vpow2.f32 %v1020_v0 }
 0x2ff   : > { %v1022_v38 = vmul.f32 1.442695, %v1011_v1 }
 0x300   : > { %v1001_v3 = vpop.xlane.xlu1 %1000 }
 0x301   : > { %2921 = vpow2.f32 %v1022_v38  ;;  %v1012_v37 = vsub.f32 %v3542_v17, %v1001_v3 }
 0x302   : > { %v3626_v7 = vpop.eup %2915 }
 0x303   : > { %v1024_v4 = vmul.f32 1.442695, %v1012_v37 }
 0x304   : > { %v1003_v5 = vpop.xlane.xlu1 %1002 }
 0x305   : > { %v1013_v2 = vsub.f32 %v3554_v26, %v1003_v5  ;;  %2923 = vpow2.f32 %v1024_v4 }
 0x306   : > { %v3629_v8 = vpop.eup %2917 }
 0x307   : > { %v1026_v9 = vmul.f32 1.442695, %v1013_v2  ;;  %v1032_v6 = vpack.c.bf16 %v3629_v8, %v3626_v7 }
 0x308   : > { %v1005_v10 = vpop.xlane.xlu1 %1004 }
 0x309   : > { %2925 = vpow2.f32 %v1026_v9  ;;  %v1014_v11 = vsub.f32 %v3566_v32, %v1005_v10  ;;  %2603 = vmatprep.mubr.bf16.mxu0 %v1032_v6 }
 0x30a   : > { %v2920_v13 = vpop.eup %2919 }
 0x30b   : > { %v1028_v12 = vmul.f32 1.442695, %v1014_v11  ;;  %v1341_v11 = vunpack.c.l.bf16 %v3540_v16 }
 0x30c   : > { %v1007_v17 = vpop.xlane.xlu1 %1006 }
 0x30d   : > { %v1015_v18 = vsub.f32 %v3576_v36, %v1007_v17  ;;  %2927 = vpow2.f32 %v1028_v12  ;;  %v1342_v12 = vunpack.c.h.bf16 %v3540_v16  ;;  %v1336_v16 = vunpack.c.h.bf16 %v3574_v35 }
 0x30e   : > { %v2922_v19 = vpop.eup %2921 }
 0x30f   : > { %v1030_v20 = vmul.f32 1.442695, %v1015_v18  ;;  %v1033_v26 = vpack.c.bf16 %v2922_v19, %v2920_v13  ;;  %v1340_v18 = vunpack.c.h.bf16 %v3552_v25 }
 0x311   : > { %2929 = vpow2.f32 %v1030_v20  ;;  %2604 = vmatmul.mubr.bf16.vlgmr.msra.gmra.mxu0 %v1033_v26  ;;  %v1338_v26 = vunpack.c.h.bf16 %v3564_v31 }
 0x312   : > { %v3635_v23 = vpop.eup %2923  ;;  %2660 = vmatpush3.bf16.msra.mxu0 %v2825_v45  ;;  %v1335_v45 = vunpack.c.l.bf16 %v3574_v35  ;;  %v1331_v35 = vunpack.c.l.bf16 %v3597_v47 }
 0x313   : > { %2661 = vmatprep.subr.bf16.mxu0 %v2826_v46 }
 0x316   : > { %v3637_v24 = vpop.eup %2925  ;;  %2662 = vmatpush3.bf16.msra.mxu0 %v2826_v46 }
 0x317   : > { %v1034_v27 = vpack.c.bf16 %v3637_v24, %v3635_v23  ;;  %2663 = vmatprep.subr.bf16.mxu0 %v2827_v48 }
 0x319   : > { %2607 = vmatprep.mubr.bf16.mxu0 %v1034_v27 }
 0x31a   : > { %v3641_v32 = vpop.eup %2927  ;;  %2664 = vmatpush3.bf16.msra.mxu0 %v2827_v48  ;;  %v1334_v48 = vunpack.c.h.bf16 %v3590_v44 }
 0x31b   : > { %2665 = vmatprep.subr.bf16.mxu0 %v2828_v49 }
 0x31e   : > { %v3643_v28 = vpop.eup %2929  ;;  %2666 = vmatpush3.bf16.msra.mxu0 %v2828_v49 }
 0x31f   : > { %v1035_v36 = vpack.c.bf16 %v3643_v28, %v3641_v32  ;;  %2667 = vmatprep.subr.bf16.mxu0 %v2829_v51 }
 0x321   : > { %2608 = vmatmul.mubr.bf16.gmra.mxu0 %v1035_v36 }
 0x322   : > { %2668 = vmatpush3.bf16.msra.mxu0 %v2829_v51 }
 0x323   : > { %2669 = vmatprep.subr.bf16.mxu0 %v2830_v54 }
 0x326   : > { %2670 = vmatpush3.bf16.msra.mxu0 %v2830_v54  ;;  %v1332_v54 = vunpack.c.h.bf16 %v3597_v47 }
 0x338   : > { %v1197_v33 = vpop.trf.xlu0 }
 0x339   : > { %2619 = vmatprep.mubr.msk.bf16.mxu1 %vm1205_vm0, %v1197_v33 }
 0x33c   : > { %v1198_v34 = vpop.trf.xlu0 }
 0x33d   : > { %2620 = vmatmul.mubr.msk.bf16.vlgmr.msra.gmra.mxu1 %vm1205_vm0, %v1198_v34  ;;  %v1337_v34 = vunpack.c.l.bf16 %v3564_v31  ;;  %v1333_v31 = vunpack.c.l.bf16 %v3590_v44  ;;  %v1329_v44 = vunpack.c.l.bf16 %v3604_v50 }
 0x340   : > { %v1199_v39 = vpop.trf.xlu0 }
 0x341   : > { %2623 = vmatprep.mubr.msk.bf16.mxu1 %vm1205_vm0, %v1199_v39 }
 0x344   : > { %v1200_v40 = vpop.trf.xlu0 }
 0x345   : > { %2624 = vmatmul.mubr.msk.bf16.gmra.mxu1 %vm1205_vm0, %v1200_v40 }
 0x348   : > { %v1201_v41 = vpop.trf.xlu0 }
 0x349   : > { %2627 = vmatprep.mubr.msk.bf16.mxu1 %vm1205_vm0, %v1201_v41 }
 0x34c   : > { %v1202_v42 = vpop.trf.xlu0 }
 0x34d   : > { %2628 = vmatmul.mubr.msk.bf16.gmra.mxu1 %vm1205_vm0, %v1202_v42 }
 0x350   : > { %v1203_v43 = vpop.trf.xlu0 }
 0x351   : > { %2631 = vmatprep.mubr.msk.bf16.mxu1 %vm1205_vm0, %v1203_v43 }
 0x354   : > { %v1204_v14 = vpop.trf.xlu0 }
 0x355   : > { %2632 = vmatmul.mubr.msk.bf16.gmra.mxu1 %vm1205_vm0, %v1204_v14 }
 0x3d1   : > { %v2605_v21 = vpop.f32.mrf.mxu0 }
 0x3d2   : > { %2931 = vrcp.f32 %v2605_v21 }
 0x3d3   : > { %v1134_v53 = vpop.f32.mrf.mxu0 }
 0x3d4   : > { %2933 = vrcp.f32 %v1134_v53 }
 0x3d5   : > { %v2606_v15 = vpop.f32.mrf.mxu0 }
 0x3d6   : > { %2935 = vrcp.f32 %v2606_v15 }
 0x3d7   : > { %v1137_v55 = vpop.f32.mrf.mxu0 }
 0x3d8   : > { %2937 = vrcp.f32 %v1137_v55 }
 0x3df   : > { %v2932_v56 = vpop.eup %2931 }
 0x3e0   : > { %v3673_v29 = vmul.f32 %v2932_v56, %v2920_v13  ;;  %v1339_v13 = vunpack.c.l.bf16 %v3552_v25 }
 0x3e1   : > { %v2934_v57 = vpop.eup %2933  ;;  %v2609_v20 = vpop.f32.mrf.mxu0 }
 0x3e2   : > { %v1173_v60 = vmul.f32 %v2934_v57, %v3626_v7  ;;  %v1330_v57 = vunpack.c.h.bf16 %v3604_v50 }
 0x3e3   : > { %v2936_v22 = vpop.eup %2935  ;;  %v1150_v42 = vpop.f32.mrf.mxu0 }
 0x3e4   : > { %v3675_v58 = vmul.f32 %v2936_v22, %v2922_v19 }
 0x3e5   : > { %v2938_v59 = vpop.eup %2937  ;;  %v2610_v46 = vpop.f32.mrf.mxu0 }
 0x3e6   : > { %v1174_v61 = vmul.f32 %v2938_v59, %v3629_v8  ;;  %v1360_v63 = vpack.c.bf16 %v3675_v58, %v3673_v29 }
 0x3e7   : > { %v1153_v53 = vpop.f32.mrf.mxu0 }
 0x3e8   : > { %v1359_v0 = vpack.c.bf16 %v1174_v61, %v1173_v60  ;;  %2939 = vrcp.f32 %v1153_v53 }
 0x3e9   : > { %2941 = vrcp.f32 %v1150_v42 }
 0x3ea   : > { %2651 = vmatprep.mubr.bf16.mxu1 %v1359_v0  ;;  %v1328_v0 = vunpack.c.h.bf16 %v3611_v52  ;;  %2943 = vrcp.f32 %v2610_v46 }
 0x3eb   : > { %2945 = vrcp.f32 %v2609_v20 }
 0x3fd   : > { %v3681_v30 = vpop.f32.mrf.mxu1 }
 0x3fe   : > { %v1345_v47 = vmul.f32 %v3681_v30, %v1329_v44  ;;  %v3033_v44 = vld [vmem:[%s3445_s9 + $0x30] sm:$0xff] }
 0x3ff   : > { %v3683_v1 = vpop.f32.mrf.mxu1 }
 0x401   : > { %v2622_v38 = vpop.f32.mrf.mxu1 }
 0x402   : > { %v1346_v61 = vmul.f32 %v2622_v38, %v1330_v57 }
 0x403   : > { %v3685_v3 = vpop.f32.mrf.mxu1 }
 0x405   : > { %v2625_v37 = vpop.f32.mrf.mxu1 }
 0x406   : > { %v1349_v56 = vmul.f32 %v2625_v37, %v1333_v31  ;;  %v1327_v37 = vunpack.c.l.bf16 %v3611_v52 }
 0x407   : > { %v1280_v4 = vpop.f32.mrf.mxu1 }
 0x408   : > { %v1347_v60 = vmul.f32 %v1331_v35, %v1280_v4  ;;  %v1343_v50 = vmul.f32 %v1327_v37, %v3683_v1  ;;  %v2940_v4 = vpop.eup %2939  ;;  %v2835_v37 = vld [vmem:[#allocation7 + $0x74] ss:$8 sps:$4 sm:$0xff]  }
 0x409   : > { %v2626_v5 = vpop.f32.mrf.mxu1 }
 0x40a   : > { %v1350_v15 = vmul.f32 %v2626_v5, %v1334_v48  ;;  %v3029_v48 = vld [vmem:[%s3445_s9 + $0x10] sm:$0xff] }
 0x40b   : > { %v1283_v2 = vpop.f32.mrf.mxu1 }
 0x40c   : > { %v1366_v22 = vpack.c.bf16 %v1350_v15, %v1349_v56  ;;  %v1348_v59 = vmul.f32 %v1332_v54, %v1283_v2  ;;  %v1344_v2 = vmul.f32 %v1328_v0, %v3685_v3  ;;  %v3034_v0 = vld [vmem:[%s3445_s9 + $0x38] sm:$0xff] }
 0x40d   : > { %v2629_v9 = vpop.f32.mrf.mxu1 }
 0x40e   : > { %v1353_v25 = vmul.f32 %v2629_v9, %v1337_v34  ;;  %v1365_v5 = vpack.c.bf16 %v1348_v59, %v1347_v60  ;;  %v1364_v9 = vpack.c.bf16 %v1346_v61, %v1345_v47  ;;  %v1363_v38 = vpack.c.bf16 %v1344_v2, %v1343_v50  ;;  %v2833_v47 = vld [vmem:[#allocation7 + $0x70] ss:$8 sps:$4 sm:$0xff]  }
 0x40f   : > { %v1296_v7 = vpop.f32.mrf.mxu1 }
 0x410   : > { %v1351_v51 = vmul.f32 %v1335_v45, %v1296_v7  ;;  %v2942_v7 = vpop.eup %2941 }
 0x411   : > { %v2630_v6 = vpop.f32.mrf.mxu1  ;;  %v1177_v30 = vmul.f32 %v2942_v7, %v3635_v23  ;;  %v2944_v52 = vpop.eup %2943  ;;  %v2831_v23 = vld [vmem:[%s3975_s4 + $0x8] sm:$0xff]  }
 0x412   : > { %v1354_v43 = vmul.f32 %v2630_v6, %v1338_v26  ;;  %v1178_v6 = vmul.f32 %v2940_v4, %v3637_v24  ;;  %v2946_v3 = vpop.eup %2945  ;;  %v1180_v1 = vmul.f32 %v2944_v52, %v3643_v28  ;;  %2671 = vmatprep.subr.bf16.mxu0 %v2831_v23  ;;  %v2832_v24 = vld [vmem:[%s3975_s4] sm:$0xff]  }
 0x413   : > { %v1299_v8 = vpop.f32.mrf.mxu1  ;;  %2672 = vmatpush3.bf16.msra.mxu0 %v2831_v23 }
 0x414   : > { %v1368_v49 = vpack.c.bf16 %v1354_v43, %v1353_v25  ;;  %v1352_v21 = vmul.f32 %v1336_v16, %v1299_v8  ;;  %v1361_v8 = vpack.c.bf16 %v1178_v6, %v1177_v30  ;;  %2673 = vmatprep.subr.bf16.mxu0 %v2832_v24  ;;  %v3028_v25 = vld [vmem:[%s3445_s9 + $0x8] sm:$0xff] }
 0x415   : > { %v2633_v10 = vpop.f32.mrf.mxu1 }
 0x416   : > { %v1357_v27 = vmul.f32 %v2633_v10, %v1341_v11  ;;  %v1367_v55 = vpack.c.bf16 %v1352_v21, %v1351_v51  ;;  %v1179_v10 = vmul.f32 %v2946_v3, %v3641_v32  ;;  %v3030_v51 = vld [vmem:[%s3445_s9 + $0x18] sm:$0xff] }
 0x417   : > { %v1312_v17 = vpop.f32.mrf.mxu1  ;;  %2674 = vmatpush3.bf16.msra.mxu0 %v2832_v24 }
 0x418   : > { %v1355_v39 = vmul.f32 %v1339_v13, %v1312_v17  ;;  %v1362_v11 = vpack.c.bf16 %v1180_v1, %v1179_v10 }
 0x419   : > { %v2634_v19 = vpop.f32.mrf.mxu1 }
 0x41a   : > { %v1358_v36 = vmul.f32 %v2634_v19, %v1342_v12 }
 0x41b   : > { %v1315_v33 = vpop.f32.mrf.mxu1 }
 0x41c   : > { %v1370_v40 = vpack.c.bf16 %v1358_v36, %v1357_v27  ;;  %v1356_v41 = vmul.f32 %v1340_v18, %v1315_v33  ;;  %v2396_v36 = vld [vmem:[%s3976_s5] ss:$0 sm:$0xff] }
 0x41e   : > { %v1369_v14 = vpack.c.bf16 %v1356_v41, %v1355_v39  ;;  %2635 = vmatprep.subr.bf16.mxu1 %v1370_v40 }
 0x41f   : > { %2636 = vmatpush3.bf16.msra.mxu1 %v1370_v40  ;;  %v3027_v40 = vld [vmem:[%s3445_s9] sm:$0xff] }
 0x420   : > { %2637 = vmatprep.subr.bf16.mxu1 %v1369_v14 }
 0x423   : > { %2638 = vmatpush3.bf16.msra.mxu1 %v1369_v14 }
 0x424   : > { %2639 = vmatprep.subr.bf16.mxu1 %v1368_v49 }
 0x427   : > { %2640 = vmatpush3.bf16.msra.mxu1 %v1368_v49 }
 0x428   : > { %2641 = vmatprep.subr.bf16.mxu1 %v1367_v55 }
 0x42b   : > { %2642 = vmatpush3.bf16.msra.mxu1 %v1367_v55  ;;  %v3031_v55 = vld [vmem:[%s3445_s9 + $0x20] sm:$0xff] }
 0x42c   : > { %2643 = vmatprep.subr.bf16.mxu1 %v1366_v22 }
 0x42f   : > { %2644 = vmatpush3.bf16.msra.mxu1 %v1366_v22  ;;  %v3032_v22 = vld [vmem:[%s3445_s9 + $0x28] sm:$0xff]  ;;  %s2224_s9 = scalar_lea.sflag [#allocation4], %s3439_s27 }
 0x430   : > { %2645 = vmatprep.subr.bf16.mxu1 %v1365_v5 }
 0x433   : > { %2646 = vmatpush3.bf16.msra.mxu1 %v1365_v5 }
 0x434   : > { %2647 = vmatprep.subr.bf16.mxu1 %v1364_v9 }
 0x437   : > { %2648 = vmatpush3.bf16.msra.mxu1 %v1364_v9 }
 0x438   : > { %2649 = vmatprep.subr.bf16.mxu1 %v1363_v38 }
 0x43b   : > { %2650 = vmatpush3.bf16.msra.mxu1 %v1363_v38 }
 0x43c   : > { %1814 = vmatprep.subr.bf16.mxu1 %v2835_v37 }
 0x43e   : > { %2652 = vmatmul.mubr.bf16.vlgmr.msra.gmra.mxu1 %v1360_v63 }
 0x43f   : > { %2655 = vmatprep.mubr.bf16.mxu1 %v1361_v8  ;;  %1815 = vmatpush1.bf16.msra.mxu1 %v2833_v47 }
 0x446   : > { %2656 = vmatmul.mubr.bf16.gmra.mxu1 %v1362_v11 }
 0x447   : > { %1846 = vmatprep.mubr.bf16.mxu1 %v3225_v62 }
 0x4fe   : > { %v2653_v29 = vpop.f32.mrf.mxu1 }
 0x500   : > { %v1405_v28 = vpop.f32.mrf.mxu1 }
 0x502   : > { %v2654_v58 = vpop.f32.mrf.mxu1 }
 0x503   : > { %v1437_v12 = vpack.c.bf16 %v2654_v58, %v2653_v29 }
 0x504   : > { %v1408_v32 = vpop.f32.mrf.mxu1 }
 0x505   : > { %v1436_v63 = vpack.c.bf16 %v1408_v32, %v1405_v28 }
 0x506   : > { %v2657_v17 = vpop.f32.mrf.mxu1 }
 0x507   : > { %2675 = vmatprep.mubr.bf16.mxu0 %v1436_v63 }
 0x508   : > { %v1421_v13 = vpop.f32.mrf.mxu1  ;;  %2676 = vmatmul.mubr.bf16.vlgmr.msra.gmra.mxu0 %v1437_v12 }
 0x50a   : > { %v2658_v18 = vpop.f32.mrf.mxu1 }
 0x50b   : > { %v1439_v26 = vpack.c.bf16 %v2658_v18, %v2657_v17 }
 0x50c   : > { %v1424_v19 = vpop.f32.mrf.mxu1 }
 0x50d   : > { %v1438_v20 = vpack.c.bf16 %v1424_v19, %v1421_v13  ;;  %v2838_v13 = vld [vmem:[#allocation7 + $0x64] ss:$8 sps:$4 sm:$0xff]   ;;  %v2836_v19 = vld [vmem:[#allocation7 + $0x60] ss:$8 sps:$4 sm:$0xff]  }
 0x50e   : > { %1816 = vmatprep.subr.bf16.mxu1 %v2838_v13 }
 0x50f   : > { %2679 = vmatprep.mubr.bf16.mxu0 %v1438_v20  ;;  %1817 = vmatpush1.bf16.msra.mxu1 %v2836_v19 }
 0x510   : > { %2680 = vmatmul.mubr.bf16.gmra.mxu0 %v1439_v26 }
 0x5c8   : > { %v2677_v27 = vpop.f32.mrf.mxu0 }
 0x5c9   : > { %v1554_v14 = vadd.f32 %v2677_v27, %v2396_v36 }
 0x5ca   : > { %v1545_v33 = vpop.f32.mrf.mxu0 }
 0x5cb   : > { %v1546_v34 = vadd.f32 %v2396_v36, %v1545_v33  ;;  %v3732_v49 = vadd.f32 %v3029_v48, %v1554_v14  ;;  %v2848_v48 = vld [vmem:[#allocation7 + $0x20] ss:$8 sps:$4 sm:$0xff]  }
 0x5cc   : > { %v2678_v39 = vpop.f32.mrf.mxu0 }
 0x5cd   : > { %v3724_v41 = vadd.f32 %v3027_v40, %v1546_v34  ;;  %v1557_v21 = vadd.f32 %v2678_v39, %v2396_v36  ;;  %v2839_v34 = vld [vmem:[#allocation7 + $0x50] ss:$8 sps:$4 sm:$0xff]  }
 0x5ce   : > { %v1548_v42 = vpop.f32.mrf.mxu0 }
 0x5cf   : > { %v1549_v43 = vadd.f32 %v2396_v36, %v1548_v42  ;;  %1586 = vadd.xlane.f32.xlu1 %v3724_v41  ;;  %v3736_v53 = vadd.f32 %v3030_v51, %v1557_v21  ;;  %v2850_v21 = vld [vmem:[#allocation7 + $0x24] ss:$8 sps:$4 sm:$0xff]   ;;  %v2851_v51 = vld [vmem:[#allocation7 + $0x10] ss:$8 sps:$4 sm:$0xff]  }
 0x5d0   : > { %v2681_v16 = vpop.f32.mrf.mxu0 }
 0x5d1   : > { %v3728_v45 = vadd.f32 %v3028_v25, %v1549_v43  ;;  %v1570_v57 = vadd.f32 %v2681_v16, %v2396_v36  ;;  %v2844_v43 = vld [vmem:[#allocation7 + $0x44] ss:$8 sps:$4 sm:$0xff]   ;;  %v2842_v16 = vld [vmem:[#allocation7 + $0x40] ss:$8 sps:$4 sm:$0xff]   ;;  %v2847_v25 = vld [vmem:[#allocation7 + $0x34] ss:$8 sps:$4 sm:$0xff]  }
 0x5d2   : > { %v1561_v46 = vpop.f32.mrf.mxu0 }
 0x5d3   : > { %1588 = vadd.xlane.f32.xlu1 %v3728_v45  ;;  %v1562_v15 = vadd.f32 %v2396_v36, %v1561_v46  ;;  %v3748_v60 = vadd.f32 %v3033_v44, %v1570_v57  ;;  %v2845_v46 = vld [vmem:[#allocation7 + $0x30] ss:$8 sps:$4 sm:$0xff]  }
 0x5d4   : > { %v2682_v31 = vpop.f32.mrf.mxu0 }
 0x5d5   : > { %v3740_v56 = vadd.f32 %v3031_v55, %v1562_v15  ;;  %v1573_v61 = vadd.f32 %v2682_v31, %v2396_v36  ;;  %v2853_v31 = vld [vmem:[#allocation7 + $0x14] ss:$8 sps:$4 sm:$0xff]   ;;  %v2856_v15 = vld [vmem:[#allocation7 + $0x4] ss:$8 sps:$4 sm:$0xff]  }
 0x5d6   : > { %v1564_v54 = vpop.f32.mrf.mxu0 }
 0x5d7   : > { %1590 = vadd.xlane.f32.xlu1 %v3732_v49  ;;  %v1565_v35 = vadd.f32 %v2396_v36, %v1564_v54  ;;  %v3752_v5 = vadd.f32 %v3034_v0, %v1573_v61  ;;  %v2841_v36 = vld [vmem:[#allocation7 + $0x54] ss:$8 sps:$4 sm:$0xff]   ;;  %v2854_v54 = vld [vmem:[#allocation7] ss:$8 sps:$4 sm:$0xff]  }
 0x5d8   : > { %1818 = vmatprep.subr.bf16.mxu1 %v2841_v36 }
 0x5d9   : > { %v3744_v59 = vadd.f32 %v3032_v22, %v1565_v35  ;;  %1819 = vmatpush1.bf16.msra.mxu1 %v2839_v34 }
 0x5da   : > { %1820 = vmatprep.subr.bf16.mxu1 %v2844_v43 }
 0x5db   : > { %1592 = vadd.xlane.f32.xlu1 %v3736_v53 }
 0x5dd   : > { %1821 = vmatpush1.bf16.msra.mxu1 %v2842_v16 }
 0x5de   : > { %1822 = vmatprep.subr.bf16.mxu1 %v2847_v25 }
 0x5df   : > { %1594 = vadd.xlane.f32.xlu1 %v3740_v56 }
 0x5e1   : > { %1823 = vmatpush1.bf16.msra.mxu1 %v2845_v46 }
 0x5e2   : > { %1824 = vmatprep.subr.bf16.mxu1 %v2850_v21 }
 0x5e3   : > { %1596 = vadd.xlane.f32.xlu1 %v3744_v59 }
 0x5e5   : > { %1825 = vmatpush1.bf16.msra.mxu1 %v2848_v48 }
 0x5e6   : > { %1826 = vmatprep.subr.bf16.mxu1 %v2853_v31 }
 0x5e7   : > { %1598 = vadd.xlane.f32.xlu1 %v3748_v60 }
 0x5e9   : > { %1827 = vmatpush1.bf16.msra.mxu1 %v2851_v51 }
 0x5ea   : > { %1828 = vmatprep.subr.bf16.mxu1 %v2856_v15 }
 0x5eb   : > { %1600 = vadd.xlane.f32.xlu1 %v3752_v5 }
 0x5ed   : > { %1829 = vmatpush1.bf16.msra.mxu1 %v2854_v54 }
 0x658   : > { %v1587_v9 = vpop.xlane.xlu1 %1586 }
 0x659   : > { %v1602_v2 = vmul.f32 0.0078125, %v1587_v9 }
 0x65b   : > { %v3756_v50 = vsub.f32 %v3724_v41, %v1602_v2 }
 0x65c   : > { %v1589_v4 = vpop.xlane.xlu1 %1588 }
 0x65d   : > { %v1603_v38 = vmul.f32 0.0078125, %v1589_v4  ;;  %v1618_v7 = vmul.f32 %v3756_v50, %v3756_v50 }
 0x65f   : > { %v3761_v6 = vsub.f32 %v3728_v45, %v1603_v38  ;;  %1626 = vadd.xlane.f32.xlu1 %v1618_v7 }
 0x660   : > { %v1591_v30 = vpop.xlane.xlu1 %1590 }
 0x661   : > { %v1604_v52 = vmul.f32 0.0078125, %v1591_v30  ;;  %v1619_v8 = vmul.f32 %v3761_v6, %v3761_v6 }
 0x663   : > { %v3766_v3 = vsub.f32 %v3732_v49, %v1604_v52  ;;  %1628 = vadd.xlane.f32.xlu1 %v1619_v8 }
 0x664   : > { %v1593_v1 = vpop.xlane.xlu1 %1592 }
 0x665   : > { %v1605_v10 = vmul.f32 0.0078125, %v1593_v1  ;;  %v1620_v11 = vmul.f32 %v3766_v3, %v3766_v3 }
 0x667   : > { %v3771_v23 = vsub.f32 %v3736_v53, %v1605_v10  ;;  %1630 = vadd.xlane.f32.xlu1 %v1620_v11  ;;  %v2405_v10 = vld [vmem:[%s3978_s7] ss:$0 sm:$0xff] }
 0x668   : > { %v1595_v24 = vpop.xlane.xlu1 %1594 }
 0x669   : > { %v1606_v29 = vmul.f32 0.0078125, %v1595_v24  ;;  %v1621_v28 = vmul.f32 %v3771_v23, %v3771_v23 }
 0x66b   : > { %v3776_v58 = vsub.f32 %v3740_v56, %v1606_v29  ;;  %1632 = vadd.xlane.f32.xlu0 %v1621_v28 }
 0x66c   : > { %v1597_v32 = vpop.xlane.xlu1 %1596 }
 0x66d   : > { %v1607_v63 = vmul.f32 0.0078125, %v1597_v32  ;;  %v1622_v12 = vmul.f32 %v3776_v58, %v3776_v58 }
 0x66f   : > { %v3781_v17 = vsub.f32 %v3744_v59, %v1607_v63  ;;  %1634 = vadd.xlane.f32.xlu1 %v1622_v12  ;;  %v2406_v12 = vld [vmem:[%s3979_s8] ss:$0 sm:$0xff] }
 0x670   : > { %v1599_v18 = vpop.xlane.xlu1 %1598 }
 0x671   : > { %v1608_v20 = vmul.f32 0.0078125, %v1599_v18  ;;  %v1623_v26 = vmul.f32 %v3781_v17, %v3781_v17 }
 0x673   : > { %v3786_v27 = vsub.f32 %v3748_v60, %v1608_v20  ;;  %1636 = vadd.xlane.f32.xlu1 %v1623_v26 }
 0x674   : > { %v1601_v33 = vpop.xlane.xlu1 %1600 }
 0x675   : > { %v1609_v39 = vmul.f32 0.0078125, %v1601_v33  ;;  %v1624_v40 = vmul.f32 %v3786_v27, %v3786_v27 }
 0x677   : > { %v3791_v42 = vsub.f32 %v3752_v5, %v1609_v39  ;;  %1638 = vadd.xlane.f32.xlu1 %v1624_v40 }
 0x679   : > { %v1625_v14 = vmul.f32 %v3791_v42, %v3791_v42 }
 0x67b   : > { %1640 = vadd.xlane.f32.xlu1 %v1625_v14 }
 0x6e8   : > { %v1627_v55 = vpop.xlane.xlu1 %1626 }
 0x6e9   : > { %v1642_v35 = vmul.f32 0.0078125, %v1627_v55 }
 0x6eb   : > { %v1650_v57 = vadd.f32 1e-05, %v1642_v35 }
 0x6ec   : > { %v1629_v22 = vpop.xlane.xlu1 %1628 }
 0x6ed   : > { %2947 = vrsqrt.f32 %v1650_v57  ;;  %v1643_v44 = vmul.f32 0.0078125, %v1629_v22 }
 0x6ef   : > { %v1651_v61 = vadd.f32 1e-05, %v1643_v44 }
 0x6f0   : > { %v1631_v0 = vpop.xlane.xlu1 %1630 }
 0x6f1   : > { %2949 = vrsqrt.f32 %v1651_v61  ;;  %v1644_v47 = vmul.f32 0.0078125, %v1631_v0 }
 0x6f3   : > { %v1652_v37 = vadd.f32 1e-05, %v1644_v47 }
 0x6f4   : > { %v1633_v9 = vpop.xlane.xlu0 %1632 }
 0x6f5   : > { %2951 = vrsqrt.f32 %v1652_v37  ;;  %v1645_v2 = vmul.f32 0.0078125, %v1633_v9  ;;  %v2857_v9 = vld [vmem:[#allocation8 + $0x78] sm:$0xff]  }
 0x6f6   : > { %2523 = vmatprep.subr.bf16.mxu0 %v2857_v9  ;;  %2683 = vmatprep.subr.bf16.mxu1 %v2857_v9 }
 0x6f7   : > { %v1653_v4 = vadd.f32 1e-05, %v1645_v2  ;;  %v2858_v2 = vld [vmem:[#allocation8 + $0x38] sm:$0xff]  }
 0x6f8   : > { %v1635_v38 = vpop.xlane.xlu1 %1634  ;;  %2524 = vmatpush3.bf16.msra.mxu0 %v2858_v2 }
 0x6f9   : > { %2953 = vrsqrt.f32 %v1653_v4  ;;  %v1646_v7 = vmul.f32 0.0078125, %v1635_v38  ;;  %v2860_v4 = vld [vmem:[#allocation8 + $0x30] sm:$0xff]   ;;  %v2862_v38 = vld [vmem:[#allocation8 + $0x28] sm:$0xff]  }
 0x6fa   : > { %v2948_v30 = vpop.eup %2947 }
 0x6fb   : > { %v1666_v52 = vmul.f32 %v2948_v30, %v3756_v50  ;;  %v1654_v8 = vadd.f32 1e-05, %v1646_v7  ;;  %v2864_v7 = vld [vmem:[#allocation8 + $0x20] sm:$0xff]   ;;  %v2865_v30 = vld [vmem:[#allocation8 + $0x58] sm:$0xff]  }
 0x6fc   : > { %v1637_v1 = vpop.xlane.xlu1 %1636 }
 0x6fd   : > { %2955 = vrsqrt.f32 %v1654_v8  ;;  %v1647_v11 = vmul.f32 0.0078125, %v1637_v1  ;;  %v1680_v32 = vmul.f32 %v2405_v10, %v1666_v52  ;;  %v2866_v52 = vld [vmem:[#allocation8 + $0x18] sm:$0xff]   ;;  %v2867_v8 = vld [vmem:[#allocation8 + $0x50] sm:$0xff]  }
 0x6fe   : > { %v2950_v24 = vpop.eup %2949  ;;  %v2868_v1 = vld [vmem:[#allocation8 + $0x10] sm:$0xff]  }
 0x6ff   : > { %v1667_v29 = vmul.f32 %v2950_v24, %v3761_v6  ;;  %v1655_v28 = vadd.f32 1e-05, %v1647_v11  ;;  %v1694_v20 = vadd.f32 %v2406_v12, %v1680_v32  ;;  %v2870_v11 = vld [vmem:[#allocation8 + $0x8] sm:$0xff]   ;;  %v2871_v24 = vld [vmem:[#allocation8 + $0x40] sm:$0xff]  }
 0x700   : > { %v1639_v63 = vpop.xlane.xlu1 %1638 }
 0x701   : > { %2957 = vrsqrt.f32 %v1655_v28  ;;  %v1648_v50 = vmul.f32 0.0078125, %v1639_v63  ;;  %v1681_v13 = vmul.f32 %v2405_v10, %v1667_v29  ;;  %v2872_v29 = vld [vmem:[#allocation8] sm:$0xff]   ;;  %v1724_v28 = vlaneseq }
 0x702   : > { %v2952_v18 = vpop.eup %2951 }
 0x703   : > { %v1656_v19 = vadd.f32 1e-05, %v1648_v50  ;;  %v1695_v26 = vadd.f32 %v2406_v12, %v1681_v13  ;;  %v1668_v36 = vmul.f32 %v2952_v18, %v3766_v3  ;;  %v1725_v32 = vshrl.u32 %v1724_v28, 7 }
 0x704   : > { %v1641_v33 = vpop.xlane.xlu1 %1640 }
 0x705   : > { %2959 = vrsqrt.f32 %v1656_v19  ;;  %v1649_v34 = vmul.f32 0.0078125, %v1641_v33  ;;  %v1702_v6 = vpack.c.bf16 %v1695_v26, %v1694_v20  ;;  %v1682_v16 = vmul.f32 %v2405_v10, %v1668_v36 }
 0x706   : > { %v2954_v39 = vpop.eup %2953  ;;  %v1726_v63 = vsub.s32 0, %v1725_v32  ;;  %v1730_v50 = vsub.s32 1, %v1725_v32 }
 0x707   : > { %v1657_v40 = vadd.f32 1e-05, %v1649_v34  ;;  %1847 = vmatmul.mubr.bf16.vlgmr.msra.gmra.mxu1 %v1702_v6  ;;  %v1669_v43 = vmul.f32 %v2954_v39, %v3771_v23  ;;  %v1696_v46 = vadd.f32 %v2406_v12, %v1682_v16 }
 0x708   : > { %1856 = vmatprep.mubr.bf16.mxu1 %v3225_v62  ;;  %2691 = vmatpush3.bf16.msra.mxu1 %v2858_v2 }
 0x709   : > { %2961 = vrsqrt.f32 %v1657_v40  ;;  %v1683_v14 = vmul.f32 %v2405_v10, %v1669_v43 }
 0x70a   : > { %v2956_v25 = vpop.eup %2955 }
 0x70b   : > { %v1697_v48 = vadd.f32 %v2406_v12, %v1683_v14  ;;  %v1670_v21 = vmul.f32 %v2956_v25, %v3776_v58 }
 0x70d   : > { %v1703_v3 = vpack.c.bf16 %v1697_v48, %v1696_v46  ;;  %v1684_v15 = vmul.f32 %v2405_v10, %v1670_v21 }
 0x70e   : > { %v2958_v31 = vpop.eup %2957 }
 0x70f   : > { %1857 = vmatmul.mubr.bf16.gmra.mxu1 %v1703_v3  ;;  %v1671_v51 = vmul.f32 %v2958_v31, %v3781_v17  ;;  %v1698_v55 = vadd.f32 %v2406_v12, %v1684_v15 }
 0x710   : > { %1866 = vmatprep.mubr.bf16.mxu1 %v3225_v62 }
 0x711   : > { %v1685_v54 = vmul.f32 %v2405_v10, %v1671_v51 }
 0x712   : > { %v2960_v23 = vpop.eup %2959 }
 0x713   : > { %v1699_v35 = vadd.f32 %v2406_v12, %v1685_v54  ;;  %v1672_v57 = vmul.f32 %v2960_v23, %v3786_v27  ;;  %v2859_v27 = vld [vmem:[#allocation8 + $0x70] sm:$0xff]  }
 0x714   : > { %2525 = vmatprep.subr.bf16.mxu0 %v2859_v27  ;;  %2684 = vmatprep.subr.bf16.mxu1 %v2859_v27 }
 0x715   : > { %v1704_v22 = vpack.c.bf16 %v1699_v35, %v1698_v55  ;;  %v1686_v58 = vmul.f32 %v2405_v10, %v1672_v57  ;;  %2526 = vmatpush3.bf16.msra.mxu0 %v2860_v4  ;;  %2692 = vmatpush3.bf16.msra.mxu1 %v2860_v4 }
 0x716   : > { %v2962_v44 = vpop.eup %2961 }
 0x717   : > { %1867 = vmatmul.mubr.bf16.gmra.mxu1 %v1704_v22  ;;  %v1673_v61 = vmul.f32 %v2962_v44, %v3791_v42  ;;  %v1700_v47 = vadd.f32 %v2406_v12, %v1686_v58  ;;  %v2861_v42 = vld [vmem:[#allocation8 + $0x68] sm:$0xff]  }
 0x718   : > { %1876 = vmatprep.mubr.bf16.mxu1 %v3225_v62  ;;  %2527 = vmatprep.subr.bf16.mxu0 %v2861_v42  ;;  %v2863_v62 = vld [vmem:[#allocation8 + $0x60] sm:$0xff]  }
 0x719   : > { %v1687_v0 = vmul.f32 %v2405_v10, %v1673_v61  ;;  %2685 = vmatprep.subr.bf16.mxu1 %v2861_v42  ;;  %2528 = vmatpush3.bf16.msra.mxu0 %v2862_v38  ;;  %v2869_v10 = vld [vmem:[#allocation8 + $0x48] sm:$0xff]  }
 0x71a   : > { %2693 = vmatpush3.bf16.msra.mxu1 %v2862_v38  ;;  %2529 = vmatprep.subr.bf16.mxu0 %v2863_v62 }
 0x71b   : > { %v1701_v17 = vadd.f32 %v2406_v12, %v1687_v0  ;;  %2686 = vmatprep.subr.bf16.mxu1 %v2863_v62  ;;  %v1722_v12 = vld [vmem:[%s3981_s10] sm:$0x3] }
 0x71c   : > { %v3815_v13 = vrot.slane %v1722_v12, %v1726_v63  ;;  %v3817_v18 = vrot.slane %v1722_v12, %v1730_v50 }
 0x71d   : > { %v1705_v37 = vpack.c.bf16 %v1701_v17, %v1700_v47  ;;  %2530 = vmatpush3.bf16.msra.mxu0 %v2864_v7 }
 0x71e   : > { %2694 = vmatpush3.bf16.msra.mxu1 %v2864_v7  ;;  %2531 = vmatprep.subr.bf16.mxu0 %v2865_v30 }
 0x71f   : > { %1877 = vmatmul.mubr.bf16.gmra.mxu1 %v1705_v37  ;;  %2687 = vmatprep.subr.bf16.mxu1 %v2865_v30 }
 0x721   : > { %2532 = vmatpush3.bf16.msra.mxu0 %v2866_v52 }
 0x722   : > { %2695 = vmatpush3.bf16.msra.mxu1 %v2866_v52  ;;  %2533 = vmatprep.subr.bf16.mxu0 %v2867_v8 }
 0x723   : > { %2688 = vmatprep.subr.bf16.mxu1 %v2867_v8 }
 0x725   : > { %2534 = vmatpush3.bf16.msra.mxu0 %v2868_v1 }
 0x726   : > { %2696 = vmatpush3.bf16.msra.mxu1 %v2868_v1  ;;  %2535 = vmatprep.subr.bf16.mxu0 %v2869_v10 }
 0x727   : > { %2689 = vmatprep.subr.bf16.mxu1 %v2869_v10 }
 0x729   : > { %2536 = vmatpush3.bf16.msra.mxu0 %v2870_v11 }
 0x72a   : > { %2697 = vmatpush3.bf16.msra.mxu1 %v2870_v11  ;;  %2537 = vmatprep.subr.bf16.mxu0 %v2871_v24 }
 0x72b   : > { %2690 = vmatprep.subr.bf16.mxu1 %v2871_v24 }
 0x72d   : > { %2538 = vmatpush3.bf16.msra.mxu0 %v2872_v29 }
 0x72e   : > { %2698 = vmatpush3.bf16.msra.mxu1 %v2872_v29 }
 0x7c7   : > { %v1848_v19 = vpop.f32.mrf.mxu1 }
 0x7c8   : > { %v3820_v20 = vadd.f32 %v1848_v19, %v3815_v13 }
 0x7c9   : > { %v1850_v26 = vpop.f32.mrf.mxu1 }
 0x7ca   : > { %v2423_v36 = vmul.f32 -1.442695, %v3820_v20  ;;  %v3824_v33 = vadd.f32 %v1850_v26, %v3817_v18 }
 0x7cb   : > { %v1852_v34 = vpop.f32.mrf.mxu1 }
 0x7cc   : > { %2963 = vpow2.f32 %v2423_v36  ;;  %v2424_v6 = vmul.f32 -1.442695, %v3824_v33  ;;  %v3828_v39 = vadd.f32 %v1852_v34, %v3815_v13 }
 0x7cd   : > { %v1854_v40 = vpop.f32.mrf.mxu1 }
 0x7ce   : > { %2965 = vpow2.f32 %v2424_v6  ;;  %v2425_v43 = vmul.f32 -1.442695, %v3828_v39  ;;  %v3832_v16 = vadd.f32 %v1854_v40, %v3817_v18 }
 0x7cf   : > { %v1858_v14 = vpop.f32.mrf.mxu1 }
 0x7d0   : > { %2967 = vpow2.f32 %v2425_v43  ;;  %v2426_v25 = vmul.f32 -1.442695, %v3832_v16  ;;  %v3836_v46 = vadd.f32 %v1858_v14, %v3815_v13 }
 0x7d1   : > { %v1860_v48 = vpop.f32.mrf.mxu1 }
 0x7d2   : > { %2969 = vpow2.f32 %v2426_v25  ;;  %v2427_v21 = vmul.f32 -1.442695, %v3836_v46  ;;  %v3840_v3 = vadd.f32 %v1860_v48, %v3817_v18 }
 0x7d3   : > { %v1862_v31 = vpop.f32.mrf.mxu1 }
 0x7d4   : > { %2971 = vpow2.f32 %v2427_v21  ;;  %v2428_v51 = vmul.f32 -1.442695, %v3840_v3  ;;  %v3844_v15 = vadd.f32 %v1862_v31, %v3815_v13 }
 0x7d5   : > { %v1864_v54 = vpop.f32.mrf.mxu1 }
 0x7d6   : > { %2973 = vpow2.f32 %v2428_v51  ;;  %v2429_v23 = vmul.f32 -1.442695, %v3844_v15  ;;  %v3848_v55 = vadd.f32 %v1864_v54, %v3817_v18 }
 0x7d7   : > { %v1868_v35 = vpop.f32.mrf.mxu1 }
 0x7d8   : > { %2975 = vpow2.f32 %v2429_v23  ;;  %v2430_v57 = vmul.f32 -1.442695, %v3848_v55  ;;  %v3852_v22 = vadd.f32 %v1868_v35, %v3815_v13 }
 0x7d9   : > { %v2964_v44 = vpop.eup %2963  ;;  %v1870_v61 = vpop.f32.mrf.mxu1 }
 0x7da   : > { %v1935_v58 = vadd.f32 1.0, %v2964_v44  ;;  %2977 = vpow2.f32 %v2430_v57  ;;  %v2431_v0 = vmul.f32 -1.442695, %v3852_v22  ;;  %v3856_v47 = vadd.f32 %v1870_v61, %v3817_v18 }
 0x7db   : > { %v2966_v17 = vpop.eup %2965  ;;  %v1872_v37 = vpop.f32.mrf.mxu1 }
 0x7dc   : > { %2979 = vrcp.f32 %v1935_v58  ;;  %v1936_v9 = vadd.f32 1.0, %v2966_v17  ;;  %v2432_v2 = vmul.f32 -1.442695, %v3856_v47  ;;  %v3860_v27 = vadd.f32 %v1872_v37, %v3815_v13 }
 0x7dd   : > { %v2968_v4 = vpop.eup %2967  ;;  %2981 = vpow2.f32 %v2431_v0  ;;  %v1874_v42 = vpop.f32.mrf.mxu1 }
 0x7de   : > { %2983 = vrcp.f32 %v1936_v9  ;;  %v1937_v38 = vadd.f32 1.0, %v2968_v4  ;;  %v2433_v62 = vmul.f32 -1.442695, %v3860_v27  ;;  %v3864_v7 = vadd.f32 %v1874_v42, %v3817_v18 }
 0x7df   : > { %v2970_v30 = vpop.eup %2969  ;;  %2985 = vpow2.f32 %v2432_v2  ;;  %v1878_v52 = vpop.f32.mrf.mxu1 }
 0x7e0   : > { %2987 = vrcp.f32 %v1937_v38  ;;  %v1938_v8 = vadd.f32 1.0, %v2970_v30  ;;  %v2434_v1 = vmul.f32 -1.442695, %v3864_v7  ;;  %v3868_v10 = vadd.f32 %v1878_v52, %v3815_v13 }
 0x7e1   : > { %v2972_v11 = vpop.eup %2971  ;;  %2989 = vpow2.f32 %v2433_v62  ;;  %v1880_v24 = vpop.f32.mrf.mxu1 }
 0x7e2   : > { %2991 = vrcp.f32 %v1938_v8  ;;  %v1939_v29 = vadd.f32 1.0, %v2972_v11  ;;  %v2435_v28 = vmul.f32 -1.442695, %v3868_v10  ;;  %v3872_v32 = vadd.f32 %v1880_v24, %v3817_v18 }
 0x7e3   : > { %v2974_v63 = vpop.eup %2973  ;;  %2993 = vpow2.f32 %v2434_v1  ;;  %v1882_v12 = vpop.f32.mrf.mxu1 }
 0x7e4   : > { %2995 = vrcp.f32 %v1939_v29  ;;  %v1940_v50 = vadd.f32 1.0, %v2974_v63  ;;  %v2436_v19 = vmul.f32 -1.442695, %v3872_v32  ;;  %v3876_v26 = vadd.f32 %v1882_v12, %v3815_v13 }
 0x7e5   : > { %v2976_v36 = vpop.eup %2975  ;;  %2997 = vpow2.f32 %v2435_v28  ;;  %v1884_v34 = vpop.f32.mrf.mxu1 }
 0x7e6   : > { %2999 = vrcp.f32 %v1940_v50  ;;  %v1941_v6 = vadd.f32 1.0, %v2976_v36  ;;  %v2437_v40 = vmul.f32 -1.442695, %v3876_v26  ;;  %v3880_v43 = vadd.f32 %v1884_v34, %v3817_v18 }
 0x7e7   : > { %v2978_v14 = vpop.eup %2977  ;;  %3001 = vpow2.f32 %v2436_v19 }
 0x7e8   : > { %3003 = vrcp.f32 %v1941_v6  ;;  %v1942_v25 = vadd.f32 1.0, %v2978_v14  ;;  %v2438_v48 = vmul.f32 -1.442695, %v3880_v43 }
 0x7e9   : > { %v2980_v21 = vpop.eup %2979  ;;  %3005 = vpow2.f32 %v2437_v40 }
 0x7ea   : > { %v2982_v13 = vpop.eup %2981  ;;  %3007 = vrcp.f32 %v1942_v25  ;;  %v1983_v9 = vmul.f32 %v2980_v21, %v3820_v20 }
 0x7eb   : > { %v2984_v31 = vpop.eup %2983  ;;  %3009 = vpow2.f32 %v2438_v48  ;;  %v1943_v57 = vadd.f32 1.0, %v2982_v13 }
 0x7ec   : > { %v2986_v51 = vpop.eup %2985  ;;  %v1984_v0 = vmul.f32 %v2984_v31, %v3824_v33 }
 0x7ed   : > { %v2988_v54 = vpop.eup %2987  ;;  %v1944_v23 = vadd.f32 1.0, %v2986_v51 }
 0x7ee   : > { %v2990_v35 = vpop.eup %2989  ;;  %v1985_v18 = vmul.f32 %v2988_v54, %v3828_v39 }
 0x7ef   : > { %v2992_v44 = vpop.eup %2991  ;;  %v1945_v61 = vadd.f32 1.0, %v2990_v35  ;;  %3011 = vrcp.f32 %v1944_v23  ;;  %v2439_v23 = vld [vmem:[%s3983_s12] ss:$0 sm:$0xff] }
 0x7f0   : > { %v2994_v58 = vpop.eup %2993  ;;  %v1986_v17 = vmul.f32 %v2992_v44, %v3832_v16  ;;  %v1999_v62 = vpack.c.bf16 %v1985_v18, %v1983_v9 }
 0x7f1   : > { %v2996_v37 = vpop.eup %2995  ;;  %3013 = vrcp.f32 %v1945_v61  ;;  %v1946_v2 = vadd.f32 1.0, %v2994_v58 }
 0x7f2   : > { %v2998_v4 = vpop.eup %2997  ;;  %3015 = vrcp.f32 %v1943_v57  ;;  %v2000_v42 = vpack.c.bf16 %v1986_v17, %v1984_v0  ;;  %v1987_v28 = vmul.f32 %v2996_v37, %v3836_v46 }
 0x7f3   : > { %v3000_v38 = vpop.eup %2999  ;;  %3017 = vrcp.f32 %v1946_v2  ;;  %v1947_v8 = vadd.f32 1.0, %v2998_v4 }
 0x7f4   : > { %v3002_v30 = vpop.eup %3001  ;;  %2174 = vmatprep.mubr.bf16.mxu0 %v2000_v42  ;;  %v1988_v24 = vmul.f32 %v3000_v38, %v3840_v3 }
 0x7f5   : > { %v3004_v39 = vpop.eup %3003  ;;  %v1948_v52 = vadd.f32 1.0, %v3002_v30  ;;  %2175 = vmatmul.mubr.bf16.vlgmr.msra.gmra.mxu0 %v1999_v62 }
 0x7f6   : > { %v3006_v33 = vpop.eup %3005  ;;  %v1989_v1 = vmul.f32 %v3004_v39, %v3844_v15 }
 0x7f7   : > { %v3008_v16 = vpop.eup %3007  ;;  %v1949_v11 = vadd.f32 1.0, %v3006_v33  ;;  %3019 = vrcp.f32 %v1948_v52 }
 0x7f8   : > { %v3010_v20 = vpop.eup %3009  ;;  %v1990_v29 = vmul.f32 %v3008_v16, %v3848_v55  ;;  %v2001_v50 = vpack.c.bf16 %v1989_v1, %v1987_v28 }
 0x7f9   : > { %3021 = vrcp.f32 %v1949_v11  ;;  %v1950_v63 = vadd.f32 1.0, %v3010_v20 }
 0x7fa   : > { %3023 = vrcp.f32 %v1947_v8  ;;  %v2002_v12 = vpack.c.bf16 %v1990_v29, %v1988_v24 }
 0x7fb   : > { %3025 = vrcp.f32 %v1950_v63 }
 0x7fc   : > { %2182 = vmatprep.mubr.bf16.mxu0 %v2002_v12  ;;  %v3012_v19 = vpop.eup %3011 }
 0x7fd   : > { %2183 = vmatmul.mubr.bf16.gmra.mxu0 %v2001_v50  ;;  %v1992_v3 = vmul.f32 %v3012_v19, %v3856_v47 }
 0x7fe   : > { %v3014_v36 = vpop.eup %3013 }
 0x7ff   : > { %v3016_v15 = vpop.eup %3015  ;;  %v1993_v6 = vmul.f32 %v3014_v36, %v3860_v27 }
 0x800   : > { %v3018_v34 = vpop.eup %3017  ;;  %v1991_v46 = vmul.f32 %v3016_v15, %v3852_v22 }
 0x801   : > { %v1994_v55 = vmul.f32 %v3018_v34, %v3864_v7 }
 0x802   : > { %v2003_v14 = vpack.c.bf16 %v1993_v6, %v1991_v46 }
 0x803   : > { %v2004_v40 = vpack.c.bf16 %v1994_v55, %v1992_v3 }
 0x804   : > { %v3020_v25 = vpop.eup %3019 }
 0x805   : > { %2190 = vmatprep.mubr.bf16.mxu0 %v2004_v40  ;;  %v1996_v51 = vmul.f32 %v3020_v25, %v3872_v32 }
 0x806   : > { %v3022_v48 = vpop.eup %3021  ;;  %2191 = vmatmul.mubr.bf16.gmra.mxu0 %v2003_v14 }
 0x807   : > { %v3024_v21 = vpop.eup %3023  ;;  %v1997_v31 = vmul.f32 %v3022_v48, %v3876_v26 }
 0x808   : > { %v3026_v13 = vpop.eup %3025  ;;  %v1995_v47 = vmul.f32 %v3024_v21, %v3868_v10 }
 0x809   : > { %v1998_v27 = vmul.f32 %v3026_v13, %v3880_v43 }
 0x80a   : > { %v2005_v54 = vpack.c.bf16 %v1997_v31, %v1995_v47 }
 0x80b   : > { %v2006_v7 = vpack.c.bf16 %v1998_v27, %v1996_v51 }
 0x80d   : > { %2198 = vmatprep.mubr.bf16.mxu1 %v2006_v7 }
 0x80e   : > { %2199 = vmatmul.mubr.bf16.vlgmr.msra.gmra.mxu1 %v2005_v54 }
 0x8b5   : > { %v2539_v22 = vpop.f32.mrf.mxu0 }
 0x8b7   : > { %v2540_v35 = vpop.f32.mrf.mxu0 }
 0x8b8   : > { %v2541_v57 = vadd.f32 %v2540_v35, %v2539_v22 }
 0x8b9   : > { %v2542_v44 = vpop.f32.mrf.mxu0 }
 0x8ba   : > { %v2177_v26 = vadd.f32 %v2541_v57, %v2439_v23 }
 0x8bb   : > { %v2543_v18 = vpop.f32.mrf.mxu0 }
 0x8bc   : > { %v2207_v32 = vadd.f32 %v2177_v26, %v3724_v41  ;;  %v2544_v43 = vadd.f32 %v2543_v18, %v2542_v44 }
 0x8bd   : > { %v2545_v61 = vpop.f32.mrf.mxu0 }
 0x8be   : > { %2215 = vst [vmem:[%s3905_s15] sm:$0xff] %v2207_v32  ;;  %v2180_v10 = vadd.f32 %v2544_v43, %v2439_v23 }
 0x8bf   : > { %v2546_v58 = vpop.f32.mrf.mxu0 }
 0x8c0   : > { %v2208_v0 = vadd.f32 %v2180_v10, %v3728_v45  ;;  %v2547_v17 = vadd.f32 %v2546_v58, %v2545_v61 }
 0x8c1   : > { %v2548_v37 = vpop.f32.mrf.mxu0 }
 0x8c2   : > { %2216 = vst [vmem:[%s3905_s15 + $0x8] sm:$0xff] %v2208_v0  ;;  %v2185_v9 = vadd.f32 %v2547_v17, %v2439_v23 }
 0x8c3   : > { %v2549_v2 = vpop.f32.mrf.mxu0 }
 0x8c4   : > { %v2209_v41 = vadd.f32 %v2185_v9, %v3732_v49  ;;  %v2550_v4 = vadd.f32 %v2549_v2, %v2548_v37 }
 0x8c6   : > { %2217 = vst [vmem:[%s3905_s15 + $0x10] sm:$0xff] %v2209_v41  ;;  %v2188_v42 = vadd.f32 %v2550_v4, %v2439_v23  ;;  %v2551_v38 = vpop.f32.mrf.mxu0 }
 0x8c8   : > { %v2210_v62 = vadd.f32 %v2188_v42, %v3736_v53  ;;  %v2552_v30 = vpop.f32.mrf.mxu0 }
 0x8c9   : > { %v2553_v39 = vadd.f32 %v2552_v30, %v2551_v38 }
 0x8ca   : > { %2218 = vst [vmem:[%s3905_s15 + $0x18] sm:$0xff] %v2210_v62  ;;  %v2554_v52 = vpop.f32.mrf.mxu0 }
 0x8cb   : > { %v2193_v45 = vadd.f32 %v2553_v39, %v2439_v23 }
 0x8cc   : > { %v2555_v33 = vpop.f32.mrf.mxu0 }
 0x8cd   : > { %v2211_v8 = vadd.f32 %v2193_v45, %v3740_v56  ;;  %v2556_v16 = vadd.f32 %v2555_v33, %v2554_v52 }
 0x8ce   : > { %v2557_v49 = vpop.f32.mrf.mxu1 }
 0x8cf   : > { %2219 = vst [vmem:[%s3905_s15 + $0x20] sm:$0xff] %v2211_v8  ;;  %v2196_v1 = vadd.f32 %v2556_v16, %v2439_v23 }
 0x8d0   : > { %v2558_v11 = vpop.f32.mrf.mxu1 }
 0x8d1   : > { %v2212_v53 = vadd.f32 %v2196_v1, %v3744_v59  ;;  %v2559_v20 = vadd.f32 %v2558_v11, %v2557_v49 }
 0x8d2   : > { %v2560_v24 = vpop.f32.mrf.mxu1 }
 0x8d3   : > { %2220 = vst [vmem:[%s3905_s15 + $0x28] sm:$0xff] %v2212_v53  ;;  %v2201_v29 = vadd.f32 %v2559_v20, %v2439_v23 }
 0x8d4   : > { %v2561_v28 = vpop.f32.mrf.mxu1 }
 0x8d5   : > { %v2213_v63 = vadd.f32 %v2201_v29, %v3748_v60  ;;  %v2562_v12 = vadd.f32 %v2561_v28, %v2560_v24 }
 0x8d7   : > { %2221 = vst [vmem:[%s3905_s15 + $0x30] sm:$0xff] %v2213_v63  ;;  %v2204_v56 = vadd.f32 %v2562_v12, %v2439_v23 }
 0x8d9   : > { %v2214_v59 = vadd.f32 %v2204_v56, %v3752_v5 }
 0x8db   : > { %2222 = vst [vmem:[%s3905_s15 + $0x38] sm:$0xff] %v2214_v59 }
 0x8dc   : > { %3154 = shalt.err (!%p3151_p9)
}
 0x8dd   : > { %s3155_s21 = scalar_lea.hbm %s3925_s14, 1024  ;;  %s3159_s18 = scalar_lea.hbm %s3984_s13, 4096 }
 0x8de   : > { %p3156_p7 = scmp.ne.s32.totalorder %s3925_s14, %s3155_s21  ;;  %p3160_p6 = scmp.lt.s32.totalorder %s3925_s14, %s3984_s13 }
 0x8df   : > { %p3161_p10 = scmp.lt.s32.totalorder %s3159_s18, %s3155_s21 }
 0x8e0   : > { %p3157_p4 = pnand %p3156_p7, %p4020_p13 }
 0x8e1   : > { %p3162_p12 = por %p3161_p10, %p3160_p6 }
 0x8e2   : > { %p3158_p8 = pneg %p3157_p4 }
 0x8e4   : > { %p3163_p11 = pnand %p3162_p12, %p3158_p8 }
 0x8e6   : > { %3166 = shalt.err (!%p3163_p11)
}
 0x8e7   : > { %s3227_s30 = smov 128   ;;  %s3228_s11 = smov 8  }
 0x8e8   : > { %2713 = dma.vmem_to_hbm [thread:$0]  (%p4020_p13), %s3927_s20, 1024, %s3925_s14, %s2224_s9, %s3227_s30, %s3227_s30, %s3228_s11  }
 0x8e9 PF: > { %s4021_s16 = sld [smem:[#allocation16_spill]]  ;;  %p2740_p3 = scmp.ge.s32.totalorder %s3213_s28, 2 }
 0x8ea   : > { %s2252_s29 = sand.u32 1, %s3201_s25  }
 0x8eb   : > { %s2253_s23 = scalar_lea.sflag [#allocation4], %s2252_s29 }
 0x8ef   : > { %p4022_p0 = scmp.ne.s32.totalorder %s4021_s16, 0 }
 0x8f1   : > { %p2730_p1 = pnand %p2740_p3, %p4022_p0 }
 0x8f3   : > { %p2731_p2 = pneg %p2730_p1 }
 0x8f5   : > { %3196 = dma.done.wait (%p2731_p2), %s2253_s23, 1024  }
 0x8f6   : > { %3198 = vsyncadd (%p2731_p2), %s2253_s23, 4294966272  ;;  %s4023_s28 = sld [smem:[#allocation17_spill]]  ;;  %s4026_s25 = smov %s3205_s26 }
 0x8f7   : > { %s4024_s22 = sld [smem:[#allocation15_spill]] }
 0x8f8   : > { %s4025_s27 = sld [smem:[#allocation18_spill]] }
 0x8fc   : > { %p28_p5 = scmp.ge.s32.totalorder %s4023_s28, 6  }
 0x8fd   : > { %s4027_s26 = smov %s4024_s22 }
 0x8fe   :  { %30 = sbr.rel (!%p28_p5) target bundleno = 11 (0xb), region = 129 }
 0x903   :  { %2258 = vsyncpa [#allocation3], 1 }
 0x904   :  { %2260 = vsyncpa [#allocation3 + $0x1], 1 }
 0x905   :  { %2261 = vsyncpa [#allocation6], 1 }
 0x906   :  { %2262 = vsyncpa [#allocation9], 1 }
 0x907   :  { %2263 = vsyncpa [#allocation4], 1 }
 0x908   :  { %2265 = vsyncpa [#allocation4 + $0x1], 1 }

</bundles_post_ra>
